<compile_context>
chip_gen: v7x
topology: tpu7x:2x2x1
jax: 0.10.0
libtpu: 0.0.40
codegen_flags: <defaults>
</compile_context>

<pallas_src>
import functools

import jax
import jax.numpy as jnp
from jax import lax
from jax.experimental import pallas as pl
from jax.experimental.pallas import tpu as pltpu


def _round_up(x, m):
    return (x + m - 1) // m * m


def _vmem_limit_bytes():
    """~80% of physical VMEM (v5e/v6e 128 MiB -> ~102 MiB, v7x 64 MiB -> ~51 MiB)."""
    cap = 128 * 1024 * 1024
    try:
        cap = int(getattr(pltpu.get_tpu_info(), "vmem_capacity_bytes", cap))
    except Exception:
        pass
    return int(cap * 0.8)


# --------------------------- kernels ---------------------------


def rezero_gcn_layers_kernel(h0_ref, hw0_ref, a_ref, w_conv_ref, b_conv_ref,
                             alpha_ref, beta_ref, h_ref, hw_ref,
                             *, tile_m, num_layers, a_resident, activation):
    """One GCN+ReZero layer step for one row tile.

    grid = (num_layers, num_row_tiles); the layer axis is outer / sequential.

    h_ref  : (N_pad, H_pad) f32 OUTPUT with a constant index map -> stays
             VMEM-resident for the whole grid (the ReZero state) and is
             written back to HBM exactly once at the end.
    hw_ref : (2, N_pad, H_pad) bf16 scratch; slot l%2 holds h_l @ W_conv[l]
             (read by every row tile of layer l), the other slot is filled
             tile by tile with h_{l+1} @ W_conv[l+1] for the next layer.
    """
    l = pl.program_id(0)
    t = pl.program_id(1)
    row0 = pl.multiple_of(t * tile_m, tile_m)
    rows = pl.ds(row0, tile_m)

    # One-time seed of layer 0's transform (precomputed outside the kernel):
    # a plain VMEM->VMEM copy instead of the old full-matrix matmul snapshot.
    @pl.when(jnp.logical_and(l == 0, t == 0))
    def _():
        hw_ref[0] = hw0_ref[...]

    # Seed the ReZero state from the hoisted input projection, tile by tile.
    @pl.when(l == 0)
    def _():
        h_ref[rows, :] = h0_ref[...]

    # ---- aggregate: A_hat[rows] @ (h_l @ W_l) + b_l (bf16 MXU, f32 acc) ----
    if a_resident:
        a_tile = a_ref[rows, :]      # A_hat resident in VMEM, sliced in-kernel
    else:
        a_tile = a_ref[...]          # streamed (tile_m, N_pad) row tile
    hc = jnp.dot(a_tile, hw_ref[l % 2],
                 preferred_element_type=jnp.float32) + b_conv_ref[l]
    if activation == "ReLU":
        hc = jnp.maximum(hc, 0.0)
    else:                            # spec default: 'Tanh'
        hc = jnp.tanh(hc)
    # TODO(synk): F.dropout is identity at inference and bn=False in the spec,
    # so no dropout mask / BatchNorm is applied here.

    # ---- ReZero residual update ----
    h_old = h_ref[rows, :]
    h_new = beta_ref[l] * h_old + alpha_ref[l] * hc
    h_ref[rows, :] = h_new

    # ---- this tile's slice of the NEXT layer's transform: distributed over
    #      row tiles (no layer-boundary bubble), written into the other slot
    #      of the ping-pong scratch so layer l's reads are never clobbered ----
    @pl.when(l + 1 < num_layers)
    def _():
        hw_next = jnp.dot(h_new.astype(jnp.bfloat16), w_conv_ref[l + 1],
                          preferred_element_type=jnp.float32).astype(jnp.bfloat16)

        @pl.when(l % 2 == 0)
        def _():
            hw_ref[1, rows, :] = hw_next

        @pl.when(l % 2 == 1)
        def _():
            hw_ref[0, rows, :] = hw_next


def output_head_kernel(h_ref, w_out_ref, b_out_ref, out_ref, *, num_classes):
    """logits = h @ W_out + b_out, then log_softmax over the valid classes."""
    logits = (jnp.dot(h_ref[...].astype(jnp.bfloat16), w_out_ref[...],
                      preferred_element_type=jnp.float32) + b_out_ref[...])
    col = lax.broadcasted_iota(jnp.int32, logits.shape, 1)
    logits = jnp.where(col < num_classes, logits, jnp.float32(-1e30))
    m = jnp.max(logits, axis=1, keepdims=True)
    z = logits - m
    lse = jnp.log(jnp.sum(jnp.exp(z), axis=1, keepdims=True))
    out_ref[...] = z - lse


# --------------------------- wrapper ---------------------------


def rezero_gcn_forward(x, a_hat, params, num_layers, *, tile_m=512,
                       activation="Tanh", force_stream_a=None):
    """Pads to lane-dense shapes, hoists the input projection / layer-0
    transform to plain XLA, runs the fused per-layer kernel over a
    (layers, row-tiles) grid, then a tiny row-parallel output-head kernel."""
    assert num_layers >= 1
    n, _ = x.shape
    hid = params["w_in"].shape[1]
    c_out = params["w_out"].shape[1]

    f32, bf16 = jnp.float32, jnp.bfloat16
    n_pad = _round_up(n, 128)
    hid_p = _round_up(hid, 128)
    c_out_p = _round_up(c_out, 128)

    # Row tile: largest requested size that divides n_pad (n_pad % 128 == 0).
    tile_m = max(128, min(tile_m, n_pad))
    while n_pad % tile_m != 0:
        tile_m //= 2

    # ---- hoisted input projection (f32) and layer-0 transform (bf16) ----
    h0 = x.astype(f32) @ params["w_in"].astype(f32) + params["b_in"].astype(f32)
    hw0 = jnp.dot(h0.astype(bf16), params["w_conv"][0].astype(bf16),
                  preferred_element_type=f32).astype(bf16)

    def pad_to(arr, shape, dtype):
        buf = jnp.zeros(shape, dtype)
        return buf.at[tuple(slice(0, s) for s in arr.shape)].set(arr.astype(dtype))

    # NOTE: padded rows/columns of every operand are zero.  In particular the
    # zero padded *columns* of A_hat guarantee that the (possibly nonzero)
    # padded rows h develops over the layers never contaminate valid rows.
    h0p = pad_to(h0, (n_pad, hid_p), f32)
    hw0p = pad_to(hw0, (n_pad, hid_p), bf16)
    ap = pad_to(a_hat, (n_pad, n_pad), bf16)
    wc = pad_to(params["w_conv"], (num_layers, hid_p, hid_p), bf16)
    bc = pad_to(params["b_conv"], (num_layers, 1, hid_p), f32)
    wo = pad_to(params["w_out"], (hid_p, c_out_p), bf16)
    bo = pad_to(params["b_out"], (1, c_out_p), f32)
    # Per-layer ReZero scalars pre-broadcast to lane-dense (1, H_pad) rows.
    al = jnp.zeros((num_layers, 1, hid_p), f32) + params["alpha"].astype(f32)[:, None, None]
    be = jnp.zeros((num_layers, 1, hid_p), f32) + params["beta"].astype(f32)[:, None, None]

    # ---- VMEM budget: keep A_hat fully resident when it fits ----
    vmem_limit = _vmem_limit_bytes()
    fixed_bytes = (2 * n_pad * hid_p * 2       # hW ping-pong scratch (bf16)
                   + 2 * n_pad * hid_p * 4     # resident h output (worst case 2x)
                   + 2 * n_pad * hid_p * 2     # hW0 (worst case 2x)
                   + 2 * tile_m * hid_p * 4    # streamed h0 row tiles
                   + 2 * num_layers * hid_p * hid_p * 2
                   + 8 * num_layers * hid_p * 4)
    if force_stream_a is None:
        a_resident = fixed_bytes + 2 * n_pad * n_pad * 2 <= int(0.75 * vmem_limit)
    else:
        a_resident = not force_stream_a
    if not a_resident:
        # Shrink the streamed A row tile until its double buffer fits.
        while tile_m > 128 and fixed_bytes + 2 * tile_m * n_pad * 2 > int(0.75 * vmem_limit):
            tile_m //= 2
        # TODO(synk): for graphs where even a 128-row A tile does not fit, add
        # a K grid axis tiling the contraction dim (needed on v7x's 64 MiB).
    num_tiles = n_pad // tile_m

    main_cost = pl.CostEstimate(
        flops=int(num_layers * 2 * n_pad * n_pad * hid_p
                  + max(num_layers - 1, 0) * 2 * n_pad * hid_p * hid_p),
        transcendentals=int(num_layers * n_pad * hid_p),
        bytes_accessed=int((1 if a_resident else num_layers) * n_pad * n_pad * 2
                           + num_layers * n_pad * hid_p * 4
                           + n_pad * hid_p * 6
                           + num_layers * hid_p * hid_p * 2),
    )
    head_cost = pl.CostEstimate(
        flops=int(2 * n_pad * hid_p * c_out_p),
        transcendentals=int(n_pad * c_out_p),
        bytes_accessed=int(n_pad * hid_p * 4 + hid_p * c_out_p * 2
                           + n_pad * c_out_p * 4),
    )

    def run(single_buffer):
        def const_spec(shape, index_map):
            # Operands that never change across the grid: single-buffer them
            # so they do not burn 2x VMEM.
            if single_buffer:
                return pl.BlockSpec(shape, index_map, pipeline_mode=pl.Buffered(1))
            return pl.BlockSpec(shape, index_map)

        if a_resident:
            a_spec = const_spec((n_pad, n_pad), lambda l, t: (0, 0))
        else:
            a_spec = pl.BlockSpec((tile_m, n_pad), lambda l, t: (t, 0))

        layers_kernel = functools.partial(
            rezero_gcn_layers_kernel, tile_m=tile_m, num_layers=num_layers,
            a_resident=a_resident, activation=activation)

        h_final = pl.pallas_call(
            layers_kernel,
            out_shape=jax.ShapeDtypeStruct((n_pad, hid_p), f32),
            grid_spec=pltpu.PrefetchScalarGridSpec(
                num_scalar_prefetch=0,
                grid=(num_layers, num_tiles),
                in_specs=[
                    # h0 row tile (only read at layer 0; re-fetched per layer,
                    # but it is hid_p-wide and therefore cheap next to A).
                    pl.BlockSpec((tile_m, hid_p), lambda l, t: (t, 0)),
                    const_spec((n_pad, hid_p), lambda l, t: (0, 0)),             # hW0
                    a_spec,                                                      # A_hat
                    const_spec((num_layers, hid_p, hid_p),
                               lambda l, t: (0, 0, 0)),                          # W_conv stack
                    const_spec((num_layers, 1, hid_p), lambda l, t: (0, 0, 0)),  # b_conv
                    const_spec((num_layers, 1, hid_p), lambda l, t: (0, 0, 0)),  # alpha
                    const_spec((num_layers, 1, hid_p), lambda l, t: (0, 0, 0)),  # beta
                ],
                # Constant index map => h stays VMEM-resident for the whole
                # grid (ReZero state) and is written back to HBM exactly once.
                out_specs=pl.BlockSpec((n_pad, hid_p), lambda l, t: (0, 0)),
                scratch_shapes=[pltpu.VMEM((2, n_pad, hid_p), bf16)],
            ),
            compiler_params=pltpu.CompilerParams(
                # Both axes sequential: layers are a dependence chain and the
                # row tiles of a layer share the resident hW scratch / h.
                # TODO(synk): v7x megacore needs a per-layer transform call +
                # row-parallel aggregate call (or core_map + VMEM_SHARED hW).
                dimension_semantics=("arbitrary", "arbitrary"),
                vmem_limit_bytes=vmem_limit),
            cost_estimate=main_cost,
        )(h0p, hw0p, ap, wc, bc, al, be)

        out_padded = pl.pallas_call(
            functools.partial(output_head_kernel, num_classes=c_out),
            out_shape=jax.ShapeDtypeStruct((n_pad, c_out_p), f32),
            grid_spec=pltpu.PrefetchScalarGridSpec(
                num_scalar_prefetch=0,
                grid=(num_tiles,),
                in_specs=[pl.BlockSpec((tile_m, hid_p), lambda t: (t, 0)),
                          const_spec((hid_p, c_out_p), lambda t: (0, 0)),
                          const_spec((1, c_out_p), lambda t: (0, 0))],
                out_specs=pl.BlockSpec((tile_m, c_out_p), lambda t: (t, 0)),
            ),
            compiler_params=pltpu.CompilerParams(
                dimension_semantics=("parallel",),
                vmem_limit_bytes=vmem_limit),
            cost_estimate=head_cost,
        )(h_final, wo, bo)
        return out_padded

    try:
        out_padded = run(single_buffer=True)
    except Exception:
        # Some jax versions reject pl.Buffered(1); retry with default (double)
        # buffering for the constant-index-map operands.
        out_padded = run(single_buffer=False)
    return out_padded[:n, :c_out]


# ---------------- plain-JAX glue + references ----------------


def build_norm_adj(edge_index, num_nodes):
    """Dense GCN normalization: A_hat = D^-1/2 (A + I) D^-1/2."""
    row, col = edge_index
    a = jnp.zeros((num_nodes, num_nodes), jnp.float32)
    a = a.at[row, col].set(1.0)
    a = jnp.maximum(a, jnp.eye(num_nodes, dtype=jnp.float32))  # add self loops
    deg = a.sum(axis=1)
    d_inv_sqrt = jnp.where(deg > 0, 1.0 / jnp.sqrt(deg), 0.0)
    return d_inv_sqrt[:, None] * a * d_inv_sqrt[None, :]


def reference_forward(x, a_hat, params, num_layers, *, activation="Tanh",
                      match_kernel_precision=False):
    """Pure-JAX reference.  With match_kernel_precision=True the matmul
    operands are rounded to bf16 exactly like the kernel (f32 accumulation)."""
    f32 = jnp.float32
    if match_kernel_precision:
        rnd = lambda v: v.astype(jnp.bfloat16).astype(f32)
    else:
        rnd = lambda v: v.astype(f32)
    act = jnp.tanh if activation == "Tanh" else (lambda v: jnp.maximum(v, 0.0))
    a = rnd(a_hat)
    h = x.astype(f32) @ params["w_in"].astype(f32) + params["b_in"]  # inProj is f32
    inp = h
    for i in range(num_layers):
        hw = rnd(rnd(h) @ rnd(params["w_conv"][i]))
        hc = act(a @ hw + params["b_conv"][i])
        h = params["beta"][i] * inp + params["alpha"][i] * hc
        inp = h
    logits = rnd(h) @ rnd(params["w_out"]) + params["b_out"]
    return jax.nn.log_softmax(logits, axis=1)


def _make_case(key, n, c_in, hid, c_out, layers, n_edges):
    ks = jax.random.split(key, 9)
    x = jax.random.normal(ks[0], (n, c_in), jnp.float32)
    src = jax.random.randint(ks[1], (n_edges,), 0, n)
    dst = jax.random.randint(ks[2], (n_edges,), 0, n)
    a_hat = build_norm_adj(jnp.stack([src, dst]), n)

    def glorot(k, shape):
        lim = (6.0 / (shape[-2] + shape[-1])) ** 0.5
        return jax.random.uniform(k, shape, jnp.float32, -lim, lim)

    params = dict(
        w_in=glorot(ks[3], (c_in, hid)),
        b_in=0.01 * jax.random.normal(ks[4], (1, hid), jnp.float32),
        w_conv=glorot(ks[5], (layers, hid, hid)),
        b_conv=0.01 * jax.random.normal(ks[6], (layers, 1, hid), jnp.float32),
        # The module initializes alpha=0 / beta=1 (ReZero); use small nonzero
        # alpha so the GCN path is actually exercised by the test.
        alpha=0.1 * jnp.arange(1, layers + 1, dtype=jnp.float32),
        beta=jnp.ones((layers,), jnp.float32),
        w_out=glorot(ks[7], (hid, c_out)),
        b_out=0.01 * jax.random.normal(ks[8], (1, c_out), jnp.float32),
    )
    return x, a_hat, params


if __name__ == "__main__":
    base_key = jax.random.PRNGKey(0)
    k1, k2 = jax.random.split(base_key)

    def check(out, x, a_hat, params, layers, tag):
        ref_m = reference_forward(x, a_hat, params, layers, match_kernel_precision=True)
        assert jnp.allclose(out, ref_m, atol=3e-3, rtol=3e-3), \
            f"{tag}: mismatch vs precision-matched reference"
        ref_f = reference_forward(x, a_hat, params, layers, match_kernel_precision=False)
        assert jnp.allclose(out, ref_f, atol=7.5e-2, rtol=5e-2), \
            f"{tag}: mismatch vs f32 reference"

    # Case 1: small shapes (single row tile; A_hat auto-resident in VMEM).
    x, a_hat, params = _make_case(k1, n=16, c_in=8, hid=32, c_out=4, layers=3, n_edges=48)
    out = jax.block_until_ready(rezero_gcn_forward(x, a_hat, params, 3))
    assert out.shape == (16, 4)
    check(out, x, a_hat, params, 3, "case1")

    # Case 2: multiple row tiles (exercises the ping-pong hW scratch); run both
    # the VMEM-resident-A path and the streamed-A BlockSpec path.
    x2, a_hat2, params2 = _make_case(k2, n=300, c_in=12, hid=48, c_out=6,
                                     layers=3, n_edges=900)
    out_res = jax.block_until_ready(
        rezero_gcn_forward(x2, a_hat2, params2, 3, tile_m=128))
    out_str = jax.block_until_ready(
        rezero_gcn_forward(x2, a_hat2, params2, 3, tile_m=128, force_stream_a=True))
    assert out_res.shape == (300, 6)
    check(out_res, x2, a_hat2, params2, 3, "case2-resident")
    check(out_str, x2, a_hat2, params2, 3, "case2-streamed")
    assert jnp.allclose(out_res, out_str, atol=1e-5, rtol=1e-5), \
        "resident-A and streamed-A paths disagree"

    print("KERNEL_OK")
</pallas_src>

<mosaic_0001>
module attributes {stable_mosaic.version = 11 : i64} {
  func.func @rezero_gcn_layers_kernel(%arg0: i32, %arg1: i32, %arg2: memref<128x128xf32, #tpu.memory_space<vmem>>, %arg3: memref<128x128xbf16, #tpu.memory_space<vmem>>, %arg4: memref<128x128xbf16, #tpu.memory_space<vmem>>, %arg5: memref<3x128x128xbf16, #tpu.memory_space<vmem>>, %arg6: memref<3x1x128xf32, #tpu.memory_space<vmem>>, %arg7: memref<3x1x128xf32, #tpu.memory_space<vmem>>, %arg8: memref<3x1x128xf32, #tpu.memory_space<vmem>>, %arg9: memref<128x128xf32, #tpu.memory_space<vmem>>, %arg10: memref<2x128x128xbf16, #tpu.memory_space<vmem>>) attributes {dimension_semantics = [#tpu.dimension_semantics<arbitrary>, #tpu.dimension_semantics<arbitrary>], iteration_bounds = array<i64: 3, 1>, scalar_prefetch = 0 : i64, scratch_operands = 1 : i64, tpu.core_type = #tpu.core_type<tc>, window_params = [{transform_indices = @transform_0, window_bounds = array<i64: 128, 128>}, {pipeline_mode = #tpu.pipeline_mode<synchronous>, transform_indices = @transform_1, window_bounds = array<i64: 128, 128>}, {pipeline_mode = #tpu.pipeline_mode<synchronous>, transform_indices = @transform_2, window_bounds = array<i64: 128, 128>}, {pipeline_mode = #tpu.pipeline_mode<synchronous>, transform_indices = @transform_3, window_bounds = array<i64: 3, 128, 128>}, {pipeline_mode = #tpu.pipeline_mode<synchronous>, transform_indices = @transform_4, window_bounds = array<i64: 3, 1, 128>}, {pipeline_mode = #tpu.pipeline_mode<synchronous>, transform_indices = @transform_5, window_bounds = array<i64: 3, 1, 128>}, {pipeline_mode = #tpu.pipeline_mode<synchronous>, transform_indices = @transform_6, window_bounds = array<i64: 3, 1, 128>}, {pipeline_mode = #tpu.pipeline_mode<synchronous>, transform_indices = @transform_7, window_bounds = array<i64: 128, 128>}]} {
    %c128_i32 = arith.constant 128 : i32
    %0 = arith.muli %arg1, %c128_i32 : i32
    %1 = tpu.assume_multiple %0, 128 : i32
    %c0_i32 = arith.constant 0 : i32
    %2 = arith.cmpi eq, %arg0, %c0_i32 : i32
    %c0_i32_0 = arith.constant 0 : i32
    %3 = arith.cmpi eq, %arg1, %c0_i32_0 : i32
    %4 = arith.andi %2, %3 : i1
    %5 = arith.extui %4 : i1 to i32
    %c0_i32_1 = arith.constant 0 : i32
    %6 = arith.cmpi ne, %5, %c0_i32_1 : i32
    scf.if %6 {
      %c0_20 = arith.constant 0 : index
      %c0_21 = arith.constant 0 : index
      %51 = vector.load %arg3[%c0_20, %c0_21] : memref<128x128xbf16, #tpu.memory_space<vmem>>, vector<128x128xbf16>
      %c0_22 = arith.constant 0 : index
      %c0_23 = arith.constant 0 : index
      %c0_24 = arith.constant 0 : index
      %52 = vector.load %arg10[%c0_22, %c0_23, %c0_24] : memref<2x128x128xbf16, #tpu.memory_space<vmem>>, vector<1x128x128xbf16>
      %53 = vector.shape_cast %52 : vector<1x128x128xbf16> to vector<128x128xbf16>
      %54 = vector.shape_cast %51 : vector<128x128xbf16> to vector<1x128x128xbf16>
      tpu.vector_store %arg10[%c0_22, %c0_23, %c0_24], %54 {strides = array<i32>} : memref<2x128x128xbf16, #tpu.memory_space<vmem>>, vector<1x128x128xbf16>,
    } else {
    }
    %c0_i32_2 = arith.constant 0 : i32
    %7 = arith.cmpi eq, %arg0, %c0_i32_2 : i32
    %8 = arith.extui %7 : i1 to i32
    %c0_i32_3 = arith.constant 0 : i32
    %9 = arith.cmpi ne, %8, %c0_i32_3 : i32
    scf.if %9 {
      %c0_20 = arith.constant 0 : index
      %c0_21 = arith.constant 0 : index
      %51 = vector.load %arg2[%c0_20, %c0_21] : memref<128x128xf32, #tpu.memory_space<vmem>>, vector<128x128xf32>
      %52 = arith.index_cast %1 : i32 to index
      %c0_22 = arith.constant 0 : index
      %53 = vector.load %arg9[%52, %c0_22] : memref<128x128xf32, #tpu.memory_space<vmem>>, vector<128x128xf32>
      tpu.vector_store %arg9[%52, %c0_22], %51 {strides = array<i32>} : memref<128x128xf32, #tpu.memory_space<vmem>>, vector<128x128xf32>,
    } else {
    }
    %10 = arith.index_cast %1 : i32 to index
    %c0 = arith.constant 0 : index
    %11 = vector.load %arg4[%10, %c0] : memref<128x128xbf16, #tpu.memory_space<vmem>>, vector<128x128xbf16>
    %c2_i32 = arith.constant 2 : i32
    %c0_i32_4 = arith.constant 0 : i32
    %12 = arith.cmpi eq, %c2_i32, %c0_i32_4 : i32
    %c1_i32 = arith.constant 1 : i32
    %13 = arith.select %12, %c1_i32, %c2_i32 : i32
    %14 = arith.remsi %arg0, %13 : i32
    %c0_i32_5 = arith.constant 0 : i32
    %15 = arith.cmpi ne, %14, %c0_i32_5 : i32
    %c0_i32_6 = arith.constant 0 : i32
    %16 = arith.cmpi slt, %14, %c0_i32_6 : i32
    %c0_i32_7 = arith.constant 0 : i32
    %17 = arith.cmpi slt, %13, %c0_i32_7 : i32
    %18 = arith.xori %16, %17 : i1
    %19 = arith.andi %18, %15 : i1
    %20 = arith.addi %14, %13 : i32
    %21 = arith.select %19, %20, %14 : i32
    %22 = arith.index_cast %21 : i32 to index
    %c0_8 = arith.constant 0 : index
    %c0_9 = arith.constant 0 : index
    %23 = vector.load %arg10[%22, %c0_8, %c0_9] : memref<2x128x128xbf16, #tpu.memory_space<vmem>>, vector<1x128x128xbf16>
    %24 = vector.shape_cast %23 : vector<1x128x128xbf16> to vector<128x128xbf16>
    %cst = arith.constant dense<0.000000e+00> : vector<128x128xf32>
    %25 = tpu.matmul %11, %24, %cst {dimension_numbers = #tpu.dot_dimension_numbers<[1], [0], [0], [1], [0, 0, 1, 1], [], []>} : vector<128x128xbf16>, vector<128x128xbf16>, vector<128x128xf32> -> vector<128x128xf32>
    %26 = arith.index_cast %arg0 : i32 to index
    %c0_10 = arith.constant 0 : index
    %c0_11 = arith.constant 0 : index
    %27 = vector.load %arg6[%26, %c0_10, %c0_11] : memref<3x1x128xf32, #tpu.memory_space<vmem>>, vector<1x1x128xf32>
    %28 = vector.shape_cast %27 : vector<1x1x128xf32> to vector<1x128xf32>
    %29 = vector.broadcast %28 : vector<1x128xf32> to vector<128x128xf32>
    %30 = arith.addf %25, %29 : vector<128x128xf32>
    %31 = math.tanh %30 : vector<128x128xf32>
    %32 = arith.index_cast %1 : i32 to index
    %c0_12 = arith.constant 0 : index
    %33 = vector.load %arg9[%32, %c0_12] : memref<128x128xf32, #tpu.memory_space<vmem>>, vector<128x128xf32>
    %34 = arith.index_cast %arg0 : i32 to index
    %c0_13 = arith.constant 0 : index
    %c0_14 = arith.constant 0 : index
    %35 = vector.load %arg8[%34, %c0_13, %c0_14] : memref<3x1x128xf32, #tpu.memory_space<vmem>>, vector<1x1x128xf32>
    %36 = vector.shape_cast %35 : vector<1x1x128xf32> to vector<1x128xf32>
    %37 = vector.broadcast %36 : vector<1x128xf32> to vector<128x128xf32>
    %38 = arith.mulf %37, %33 : vector<128x128xf32>
    %39 = arith.index_cast %arg0 : i32 to index
    %c0_15 = arith.constant 0 : index
    %c0_16 = arith.constant 0 : index
    %40 = vector.load %arg7[%39, %c0_15, %c0_16] : memref<3x1x128xf32, #tpu.memory_space<vmem>>, vector<1x1x128xf32>
    %41 = vector.shape_cast %40 : vector<1x1x128xf32> to vector<1x128xf32>
    %42 = vector.broadcast %41 : vector<1x128xf32> to vector<128x128xf32>
    %43 = arith.mulf %42, %31 : vector<128x128xf32>
    %44 = arith.addf %38, %43 : vector<128x128xf32>
    %45 = arith.index_cast %1 : i32 to index
    %c0_17 = arith.constant 0 : index
    %46 = vector.load %arg9[%45, %c0_17] : memref<128x128xf32, #tpu.memory_space<vmem>>, vector<128x128xf32>
    tpu.vector_store %arg9[%45, %c0_17], %44 {strides = array<i32>} : memref<128x128xf32, #tpu.memory_space<vmem>>, vector<128x128xf32>,
    %c1_i32_18 = arith.constant 1 : i32
    %47 = arith.addi %arg0, %c1_i32_18 : i32
    %c3_i32 = arith.constant 3 : i32
    %48 = arith.cmpi slt, %47, %c3_i32 : i32
    %49 = arith.extui %48 : i1 to i32
    %c0_i32_19 = arith.constant 0 : i32
    %50 = arith.cmpi ne, %49, %c0_i32_19 : i32
    scf.if %50 {
      %51 = arith.truncf %44 : vector<128x128xf32> to vector<128x128xbf16>
      %c1_i32_20 = arith.constant 1 : i32
      %52 = arith.addi %arg0, %c1_i32_20 : i32
      %53 = arith.index_cast %52 : i32 to index
      %c0_21 = arith.constant 0 : index
      %c0_22 = arith.constant 0 : index
      %54 = vector.load %arg5[%53, %c0_21, %c0_22] : memref<3x128x128xbf16, #tpu.memory_space<vmem>>, vector<1x128x128xbf16>
      %55 = vector.shape_cast %54 : vector<1x128x128xbf16> to vector<128x128xbf16>
      %cst_23 = arith.constant dense<0.000000e+00> : vector<128x128xf32>
      %56 = tpu.matmul %51, %55, %cst_23 {dimension_numbers = #tpu.dot_dimension_numbers<[1], [0], [0], [1], [0, 0, 1, 1], [], []>} : vector<128x128xbf16>, vector<128x128xbf16>, vector<128x128xf32> -> vector<128x128xf32>
      %57 = arith.truncf %56 : vector<128x128xf32> to vector<128x128xbf16>
      %c2_i32_24 = arith.constant 2 : i32
      %c0_i32_25 = arith.constant 0 : i32
      %58 = arith.cmpi eq, %c2_i32_24, %c0_i32_25 : i32
      %c1_i32_26 = arith.constant 1 : i32
      %59 = arith.select %58, %c1_i32_26, %c2_i32_24 : i32
      %60 = arith.remsi %arg0, %59 : i32
      %c0_i32_27 = arith.constant 0 : i32
      %61 = arith.cmpi ne, %60, %c0_i32_27 : i32
      %c0_i32_28 = arith.constant 0 : i32
      %62 = arith.cmpi slt, %60, %c0_i32_28 : i32
      %c0_i32_29 = arith.constant 0 : i32
      %63 = arith.cmpi slt, %59, %c0_i32_29 : i32
      %64 = arith.xori %62, %63 : i1
      %65 = arith.andi %64, %61 : i1
      %66 = arith.addi %60, %59 : i32
      %67 = arith.select %65, %66, %60 : i32
      %c0_i32_30 = arith.constant 0 : i32
      %68 = arith.cmpi eq, %67, %c0_i32_30 : i32
      %69 = arith.extui %68 : i1 to i32
      %c0_i32_31 = arith.constant 0 : i32
      %70 = arith.cmpi ne, %69, %c0_i32_31 : i32
      scf.if %70 {
        %c1 = arith.constant 1 : index
        %84 = arith.index_cast %1 : i32 to index
        %c0_40 = arith.constant 0 : index
        %85 = vector.load %arg10[%c1, %84, %c0_40] : memref<2x128x128xbf16, #tpu.memory_space<vmem>>, vector<1x128x128xbf16>
        %86 = vector.shape_cast %85 : vector<1x128x128xbf16> to vector<128x128xbf16>
        %87 = vector.shape_cast %57 : vector<128x128xbf16> to vector<1x128x128xbf16>
        tpu.vector_store %arg10[%c1, %84, %c0_40], %87 {strides = array<i32>} : memref<2x128x128xbf16, #tpu.memory_space<vmem>>, vector<1x128x128xbf16>,
      } else {
      }
      %c2_i32_32 = arith.constant 2 : i32
      %c0_i32_33 = arith.constant 0 : i32
      %71 = arith.cmpi eq, %c2_i32_32, %c0_i32_33 : i32
      %c1_i32_34 = arith.constant 1 : i32
      %72 = arith.select %71, %c1_i32_34, %c2_i32_32 : i32
      %73 = arith.remsi %arg0, %72 : i32
      %c0_i32_35 = arith.constant 0 : i32
      %74 = arith.cmpi ne, %73, %c0_i32_35 : i32
      %c0_i32_36 = arith.constant 0 : i32
      %75 = arith.cmpi slt, %73, %c0_i32_36 : i32
      %c0_i32_37 = arith.constant 0 : i32
      %76 = arith.cmpi slt, %72, %c0_i32_37 : i32
      %77 = arith.xori %75, %76 : i1
      %78 = arith.andi %77, %74 : i1
      %79 = arith.addi %73, %72 : i32
      %80 = arith.select %78, %79, %73 : i32
      %c1_i32_38 = arith.constant 1 : i32
      %81 = arith.cmpi eq, %80, %c1_i32_38 : i32
      %82 = arith.extui %81 : i1 to i32
      %c0_i32_39 = arith.constant 0 : i32
      %83 = arith.cmpi ne, %82, %c0_i32_39 : i32
      scf.if %83 {
        %c0_40 = arith.constant 0 : index
        %84 = arith.index_cast %1 : i32 to index
        %c0_41 = arith.constant 0 : index
        %85 = vector.load %arg10[%c0_40, %84, %c0_41] : memref<2x128x128xbf16, #tpu.memory_space<vmem>>, vector<1x128x128xbf16>
        %86 = vector.shape_cast %85 : vector<1x128x128xbf16> to vector<128x128xbf16>
        %87 = vector.shape_cast %57 : vector<128x128xbf16> to vector<1x128x128xbf16>
        tpu.vector_store %arg10[%c0_40, %84, %c0_41], %87 {strides = array<i32>} : memref<2x128x128xbf16, #tpu.memory_space<vmem>>, vector<1x128x128xbf16>,
      } else {
      }
    } else {
    }
    return
  }
  func.func @transform_0(%arg0: i32, %arg1: i32) -> (i32, i32) {
    %c0_i32 = arith.constant 0 : i32
    %c0_i32_0 = arith.constant 0 : i32
    return %arg1, %c0_i32 : i32, i32
  }
  func.func @transform_1(%arg0: i32, %arg1: i32) -> (i32, i32) {
    %c0_i32 = arith.constant 0 : i32
    %c0_i32_0 = arith.constant 0 : i32
    %c0_i32_1 = arith.constant 0 : i32
    return %c0_i32, %c0_i32_0 : i32, i32
  }
  func.func @transform_2(%arg0: i32, %arg1: i32) -> (i32, i32) {
    %c0_i32 = arith.constant 0 : i32
    %c0_i32_0 = arith.constant 0 : i32
    %c0_i32_1 = arith.constant 0 : i32
    return %c0_i32, %c0_i32_0 : i32, i32
  }
  func.func @transform_3(%arg0: i32, %arg1: i32) -> (i32, i32, i32) {
    %c0_i32 = arith.constant 0 : i32
    %c0_i32_0 = arith.constant 0 : i32
    %c0_i32_1 = arith.constant 0 : i32
    %c0_i32_2 = arith.constant 0 : i32
    return %c0_i32, %c0_i32_0, %c0_i32_1 : i32, i32, i32
  }
  func.func @transform_4(%arg0: i32, %arg1: i32) -> (i32, i32, i32) {
    %c0_i32 = arith.constant 0 : i32
    %c0_i32_0 = arith.constant 0 : i32
    %c0_i32_1 = arith.constant 0 : i32
    %c0_i32_2 = arith.constant 0 : i32
    return %c0_i32, %c0_i32_0, %c0_i32_1 : i32, i32, i32
  }
  func.func @transform_5(%arg0: i32, %arg1: i32) -> (i32, i32, i32) {
    %c0_i32 = arith.constant 0 : i32
    %c0_i32_0 = arith.constant 0 : i32
    %c0_i32_1 = arith.constant 0 : i32
    %c0_i32_2 = arith.constant 0 : i32
    return %c0_i32, %c0_i32_0, %c0_i32_1 : i32, i32, i32
  }
  func.func @transform_6(%arg0: i32, %arg1: i32) -> (i32, i32, i32) {
    %c0_i32 = arith.constant 0 : i32
    %c0_i32_0 = arith.constant 0 : i32
    %c0_i32_1 = arith.constant 0 : i32
    %c0_i32_2 = arith.constant 0 : i32
    return %c0_i32, %c0_i32_0, %c0_i32_1 : i32, i32, i32
  }
  func.func @transform_7(%arg0: i32, %arg1: i32) -> (i32, i32) {
    %c0_i32 = arith.constant 0 : i32
    %c0_i32_0 = arith.constant 0 : i32
    %c0_i32_1 = arith.constant 0 : i32
    return %c0_i32, %c0_i32_0 : i32, i32
  }
}

module attributes {stable_mosaic.version = 11 : i64} {
  func.func @rezero_gcn_layers_kernel(%arg0: i32, %arg1: i32, %arg2: memref<128x128xf32, #tpu.memory_space<vmem>>, %arg3: memref<128x128xbf16, #tpu.memory_space<vmem>>, %arg4: memref<128x128xbf16, #tpu.memory_space<vmem>>, %arg5: memref<3x128x128xbf16, #tpu.memory_space<vmem>>, %arg6: memref<3x1x128xf32, #tpu.memory_space<vmem>>, %arg7: memref<3x1x128xf32, #tpu.memory_space<vmem>>, %arg8: memref<3x1x128xf32, #tpu.memory_space<vmem>>, %arg9: memref<128x128xf32, #tpu.memory_space<vmem>>, %arg10: memref<2x128x128xbf16, #tpu.memory_space<vmem>>) attributes {dimension_semantics = [#tpu.dimension_semantics<arbitrary>, #tpu.dimension_semantics<arbitrary>], iteration_bounds = array<i64: 3, 1>, scalar_prefetch = 0 : i64, scratch_operands = 1 : i64, tpu.core_type = #tpu.core_type<tc>, window_params = [{transform_indices = @transform_0, window_bounds = array<i64: 128, 128>}, {pipeline_mode = #tpu.pipeline_mode<synchronous>, transform_indices = @transform_1, window_bounds = array<i64: 128, 128>}, {pipeline_mode = #tpu.pipeline_mode<synchronous>, transform_indices = @transform_2, window_bounds = array<i64: 128, 128>}, {pipeline_mode = #tpu.pipeline_mode<synchronous>, transform_indices = @transform_3, window_bounds = array<i64: 3, 128, 128>}, {pipeline_mode = #tpu.pipeline_mode<synchronous>, transform_indices = @transform_4, window_bounds = array<i64: 3, 1, 128>}, {pipeline_mode = #tpu.pipeline_mode<synchronous>, transform_indices = @transform_5, window_bounds = array<i64: 3, 1, 128>}, {pipeline_mode = #tpu.pipeline_mode<synchronous>, transform_indices = @transform_6, window_bounds = array<i64: 3, 1, 128>}, {pipeline_mode = #tpu.pipeline_mode<synchronous>, transform_indices = @transform_7, window_bounds = array<i64: 128, 128>}]} {
    %c128_i32 = arith.constant 128 : i32
    %0 = arith.muli %arg1, %c128_i32 : i32
    %1 = tpu.assume_multiple %0, 128 : i32
    %c0_i32 = arith.constant 0 : i32
    %2 = arith.cmpi eq, %arg0, %c0_i32 : i32
    %c0_i32_0 = arith.constant 0 : i32
    %3 = arith.cmpi eq, %arg1, %c0_i32_0 : i32
    %4 = arith.andi %2, %3 : i1
    %5 = arith.extui %4 : i1 to i32
    %c0_i32_1 = arith.constant 0 : i32
    %6 = arith.cmpi ne, %5, %c0_i32_1 : i32
    scf.if %6 {
      %c0_20 = arith.constant 0 : index
      %c0_21 = arith.constant 0 : index
      %51 = vector.load %arg3[%c0_20, %c0_21] : memref<128x128xbf16, #tpu.memory_space<vmem>>, vector<128x128xbf16>
      %c0_22 = arith.constant 0 : index
      %c0_23 = arith.constant 0 : index
      %c0_24 = arith.constant 0 : index
      %52 = vector.load %arg10[%c0_22, %c0_23, %c0_24] : memref<2x128x128xbf16, #tpu.memory_space<vmem>>, vector<1x128x128xbf16>
      %53 = vector.shape_cast %52 : vector<1x128x128xbf16> to vector<128x128xbf16>
      %54 = vector.shape_cast %51 : vector<128x128xbf16> to vector<1x128x128xbf16>
      tpu.vector_store %arg10[%c0_22, %c0_23, %c0_24], %54 {strides = array<i32>} : memref<2x128x128xbf16, #tpu.memory_space<vmem>>, vector<1x128x128xbf16>,
    } else {
    }
    %c0_i32_2 = arith.constant 0 : i32
    %7 = arith.cmpi eq, %arg0, %c0_i32_2 : i32
    %8 = arith.extui %7 : i1 to i32
    %c0_i32_3 = arith.constant 0 : i32
    %9 = arith.cmpi ne, %8, %c0_i32_3 : i32
    scf.if %9 {
      %c0_20 = arith.constant 0 : index
      %c0_21 = arith.constant 0 : index
      %51 = vector.load %arg2[%c0_20, %c0_21] : memref<128x128xf32, #tpu.memory_space<vmem>>, vector<128x128xf32>
      %52 = arith.index_cast %1 : i32 to index
      %c0_22 = arith.constant 0 : index
      %53 = vector.load %arg9[%52, %c0_22] : memref<128x128xf32, #tpu.memory_space<vmem>>, vector<128x128xf32>
      tpu.vector_store %arg9[%52, %c0_22], %51 {strides = array<i32>} : memref<128x128xf32, #tpu.memory_space<vmem>>, vector<128x128xf32>,
    } else {
    }
    %10 = arith.index_cast %1 : i32 to index
    %c0 = arith.constant 0 : index
    %11 = vector.load %arg4[%10, %c0] : memref<128x128xbf16, #tpu.memory_space<vmem>>, vector<128x128xbf16>
    %c2_i32 = arith.constant 2 : i32
    %c0_i32_4 = arith.constant 0 : i32
    %12 = arith.cmpi eq, %c2_i32, %c0_i32_4 : i32
    %c1_i32 = arith.constant 1 : i32
    %13 = arith.select %12, %c1_i32, %c2_i32 : i32
    %14 = arith.remsi %arg0, %13 : i32
    %c0_i32_5 = arith.constant 0 : i32
    %15 = arith.cmpi ne, %14, %c0_i32_5 : i32
    %c0_i32_6 = arith.constant 0 : i32
    %16 = arith.cmpi slt, %14, %c0_i32_6 : i32
    %c0_i32_7 = arith.constant 0 : i32
    %17 = arith.cmpi slt, %13, %c0_i32_7 : i32
    %18 = arith.xori %16, %17 : i1
    %19 = arith.andi %18, %15 : i1
    %20 = arith.addi %14, %13 : i32
    %21 = arith.select %19, %20, %14 : i32
    %22 = arith.index_cast %21 : i32 to index
    %c0_8 = arith.constant 0 : index
    %c0_9 = arith.constant 0 : index
    %23 = vector.load %arg10[%22, %c0_8, %c0_9] : memref<2x128x128xbf16, #tpu.memory_space<vmem>>, vector<1x128x128xbf16>
    %24 = vector.shape_cast %23 : vector<1x128x128xbf16> to vector<128x128xbf16>
    %cst = arith.constant dense<0.000000e+00> : vector<128x128xf32>
    %25 = tpu.matmul %11, %24, %cst {dimension_numbers = #tpu.dot_dimension_numbers<[1], [0], [0], [1], [0, 0, 1, 1], [], []>} : vector<128x128xbf16>, vector<128x128xbf16>, vector<128x128xf32> -> vector<128x128xf32>
    %26 = arith.index_cast %arg0 : i32 to index
    %c0_10 = arith.constant 0 : index
    %c0_11 = arith.constant 0 : index
    %27 = vector.load %arg6[%26, %c0_10, %c0_11] : memref<3x1x128xf32, #tpu.memory_space<vmem>>, vector<1x1x128xf32>
    %28 = vector.shape_cast %27 : vector<1x1x128xf32> to vector<1x128xf32>
    %29 = vector.broadcast %28 : vector<1x128xf32> to vector<128x128xf32>
    %30 = arith.addf %25, %29 : vector<128x128xf32>
    %31 = math.tanh %30 : vector<128x128xf32>
    %32 = arith.index_cast %1 : i32 to index
    %c0_12 = arith.constant 0 : index
    %33 = vector.load %arg9[%32, %c0_12] : memref<128x128xf32, #tpu.memory_space<vmem>>, vector<128x128xf32>
    %34 = arith.index_cast %arg0 : i32 to index
    %c0_13 = arith.constant 0 : index
    %c0_14 = arith.constant 0 : index
    %35 = vector.load %arg8[%34, %c0_13, %c0_14] : memref<3x1x128xf32, #tpu.memory_space<vmem>>, vector<1x1x128xf32>
    %36 = vector.shape_cast %35 : vector<1x1x128xf32> to vector<1x128xf32>
    %37 = vector.broadcast %36 : vector<1x128xf32> to vector<128x128xf32>
    %38 = arith.mulf %37, %33 : vector<128x128xf32>
    %39 = arith.index_cast %arg0 : i32 to index
    %c0_15 = arith.constant 0 : index
    %c0_16 = arith.constant 0 : index
    %40 = vector.load %arg7[%39, %c0_15, %c0_16] : memref<3x1x128xf32, #tpu.memory_space<vmem>>, vector<1x1x128xf32>
    %41 = vector.shape_cast %40 : vector<1x1x128xf32> to vector<1x128xf32>
    %42 = vector.broadcast %41 : vector<1x128xf32> to vector<128x128xf32>
    %43 = arith.mulf %42, %31 : vector<128x128xf32>
    %44 = arith.addf %38, %43 : vector<128x128xf32>
    %45 = arith.index_cast %1 : i32 to index
    %c0_17 = arith.constant 0 : index
    %46 = vector.load %arg9[%45, %c0_17] : memref<128x128xf32, #tpu.memory_space<vmem>>, vector<128x128xf32>
    tpu.vector_store %arg9[%45, %c0_17], %44 {strides = array<i32>} : memref<128x128xf32, #tpu.memory_space<vmem>>, vector<128x128xf32>,
    %c1_i32_18 = arith.constant 1 : i32
    %47 = arith.addi %arg0, %c1_i32_18 : i32
    %c3_i32 = arith.constant 3 : i32
    %48 = arith.cmpi slt, %47, %c3_i32 : i32
    %49 = arith.extui %48 : i1 to i32
    %c0_i32_19 = arith.constant 0 : i32
    %50 = arith.cmpi ne, %49, %c0_i32_19 : i32
    scf.if %50 {
      %51 = arith.truncf %44 : vector<128x128xf32> to vector<128x128xbf16>
      %c1_i32_20 = arith.constant 1 : i32
      %52 = arith.addi %arg0, %c1_i32_20 : i32
      %53 = arith.index_cast %52 : i32 to index
      %c0_21 = arith.constant 0 : index
      %c0_22 = arith.constant 0 : index
      %54 = vector.load %arg5[%53, %c0_21, %c0_22] : memref<3x128x128xbf16, #tpu.memory_space<vmem>>, vector<1x128x128xbf16>
      %55 = vector.shape_cast %54 : vector<1x128x128xbf16> to vector<128x128xbf16>
      %cst_23 = arith.constant dense<0.000000e+00> : vector<128x128xf32>
      %56 = tpu.matmul %51, %55, %cst_23 {dimension_numbers = #tpu.dot_dimension_numbers<[1], [0], [0], [1], [0, 0, 1, 1], [], []>} : vector<128x128xbf16>, vector<128x128xbf16>, vector<128x128xf32> -> vector<128x128xf32>
      %57 = arith.truncf %56 : vector<128x128xf32> to vector<128x128xbf16>
      %c2_i32_24 = arith.constant 2 : i32
      %c0_i32_25 = arith.constant 0 : i32
      %58 = arith.cmpi eq, %c2_i32_24, %c0_i32_25 : i32
      %c1_i32_26 = arith.constant 1 : i32
      %59 = arith.select %58, %c1_i32_26, %c2_i32_24 : i32
      %60 = arith.remsi %arg0, %59 : i32
      %c0_i32_27 = arith.constant 0 : i32
      %61 = arith.cmpi ne, %60, %c0_i32_27 : i32
      %c0_i32_28 = arith.constant 0 : i32
      %62 = arith.cmpi slt, %60, %c0_i32_28 : i32
      %c0_i32_29 = arith.constant 0 : i32
      %63 = arith.cmpi slt, %59, %c0_i32_29 : i32
      %64 = arith.xori %62, %63 : i1
      %65 = arith.andi %64, %61 : i1
      %66 = arith.addi %60, %59 : i32
      %67 = arith.select %65, %66, %60 : i32
      %c0_i32_30 = arith.constant 0 : i32
      %68 = arith.cmpi eq, %67, %c0_i32_30 : i32
      %69 = arith.extui %68 : i1 to i32
      %c0_i32_31 = arith.constant 0 : i32
      %70 = arith.cmpi ne, %69, %c0_i32_31 : i32
      scf.if %70 {
        %c1 = arith.constant 1 : index
        %84 = arith.index_cast %1 : i32 to index
        %c0_40 = arith.constant 0 : index
        %85 = vector.load %arg10[%c1, %84, %c0_40] : memref<2x128x128xbf16, #tpu.memory_space<vmem>>, vector<1x128x128xbf16>
        %86 = vector.shape_cast %85 : vector<1x128x128xbf16> to vector<128x128xbf16>
        %87 = vector.shape_cast %57 : vector<128x128xbf16> to vector<1x128x128xbf16>
        tpu.vector_store %arg10[%c1, %84, %c0_40], %87 {strides = array<i32>} : memref<2x128x128xbf16, #tpu.memory_space<vmem>>, vector<1x128x128xbf16>,
      } else {
      }
      %c2_i32_32 = arith.constant 2 : i32
      %c0_i32_33 = arith.constant 0 : i32
      %71 = arith.cmpi eq, %c2_i32_32, %c0_i32_33 : i32
      %c1_i32_34 = arith.constant 1 : i32
      %72 = arith.select %71, %c1_i32_34, %c2_i32_32 : i32
      %73 = arith.remsi %arg0, %72 : i32
      %c0_i32_35 = arith.constant 0 : i32
      %74 = arith.cmpi ne, %73, %c0_i32_35 : i32
      %c0_i32_36 = arith.constant 0 : i32
      %75 = arith.cmpi slt, %73, %c0_i32_36 : i32
      %c0_i32_37 = arith.constant 0 : i32
      %76 = arith.cmpi slt, %72, %c0_i32_37 : i32
      %77 = arith.xori %75, %76 : i1
      %78 = arith.andi %77, %74 : i1
      %79 = arith.addi %73, %72 : i32
      %80 = arith.select %78, %79, %73 : i32
      %c1_i32_38 = arith.constant 1 : i32
      %81 = arith.cmpi eq, %80, %c1_i32_38 : i32
      %82 = arith.extui %81 : i1 to i32
      %c0_i32_39 = arith.constant 0 : i32
      %83 = arith.cmpi ne, %82, %c0_i32_39 : i32
      scf.if %83 {
        %c0_40 = arith.constant 0 : index
        %84 = arith.index_cast %1 : i32 to index
        %c0_41 = arith.constant 0 : index
        %85 = vector.load %arg10[%c0_40, %84, %c0_41] : memref<2x128x128xbf16, #tpu.memory_space<vmem>>, vector<1x128x128xbf16>
        %86 = vector.shape_cast %85 : vector<1x128x128xbf16> to vector<128x128xbf16>
        %87 = vector.shape_cast %57 : vector<128x128xbf16> to vector<1x128x128xbf16>
        tpu.vector_store %arg10[%c0_40, %84, %c0_41], %87 {strides = array<i32>} : memref<2x128x128xbf16, #tpu.memory_space<vmem>>, vector<1x128x128xbf16>,
      } else {
      }
    } else {
    }
    return
  }
  func.func @transform_0(%arg0: i32, %arg1: i32) -> (i32, i32) {
    %c0_i32 = arith.constant 0 : i32
    %c0_i32_0 = arith.constant 0 : i32
    return %arg1, %c0_i32 : i32, i32
  }
  func.func @transform_1(%arg0: i32, %arg1: i32) -> (i32, i32) {
    %c0_i32 = arith.constant 0 : i32
    %c0_i32_0 = arith.constant 0 : i32
    %c0_i32_1 = arith.constant 0 : i32
    return %c0_i32, %c0_i32_0 : i32, i32
  }
  func.func @transform_2(%arg0: i32, %arg1: i32) -> (i32, i32) {
    %c0_i32 = arith.constant 0 : i32
    %c0_i32_0 = arith.constant 0 : i32
    %c0_i32_1 = arith.constant 0 : i32
    return %c0_i32, %c0_i32_0 : i32, i32
  }
  func.func @transform_3(%arg0: i32, %arg1: i32) -> (i32, i32, i32) {
    %c0_i32 = arith.constant 0 : i32
    %c0_i32_0 = arith.constant 0 : i32
    %c0_i32_1 = arith.constant 0 : i32
    %c0_i32_2 = arith.constant 0 : i32
    return %c0_i32, %c0_i32_0, %c0_i32_1 : i32, i32, i32
  }
  func.func @transform_4(%arg0: i32, %arg1: i32) -> (i32, i32, i32) {
    %c0_i32 = arith.constant 0 : i32
    %c0_i32_0 = arith.constant 0 : i32
    %c0_i32_1 = arith.constant 0 : i32
    %c0_i32_2 = arith.constant 0 : i32
    return %c0_i32, %c0_i32_0, %c0_i32_1 : i32, i32, i32
  }
  func.func @transform_5(%arg0: i32, %arg1: i32) -> (i32, i32, i32) {
    %c0_i32 = arith.constant 0 : i32
    %c0_i32_0 = arith.constant 0 : i32
    %c0_i32_1 = arith.constant 0 : i32
    %c0_i32_2 = arith.constant 0 : i32
    return %c0_i32, %c0_i32_0, %c0_i32_1 : i32, i32, i32
  }
  func.func @transform_6(%arg0: i32, %arg1: i32) -> (i32, i32, i32) {
    %c0_i32 = arith.constant 0 : i32
    %c0_i32_0 = arith.constant 0 : i32
    %c0_i32_1 = arith.constant 0 : i32
    %c0_i32_2 = arith.constant 0 : i32
    return %c0_i32, %c0_i32_0, %c0_i32_1 : i32, i32, i32
  }
  func.func @transform_7(%arg0: i32, %arg1: i32) -> (i32, i32) {
    %c0_i32 = arith.constant 0 : i32
    %c0_i32_0 = arith.constant 0 : i32
    %c0_i32_1 = arith.constant 0 : i32
    return %c0_i32, %c0_i32_0 : i32, i32
  }
}

</mosaic_0001>

<bundles_post_ra>
// kernel: tpu_custom_call.1
= control target key start
LH: loop header
LB: loop body
LE: loop exit
PB: predicated region body
PF: predicated region fallthrough
CT: control target
= control target key end

     0   :  { %s2229_s0 = inlined_call_operand.hbm [shape: f32[128,128], index: 0, kind: input, shape index: {}]   ;;  %s2230_s1 = inlined_call_operand.hbm [shape: bf16[128,128], index: 1, kind: input, shape index: {}]   ;;  %s2231_s2 = inlined_call_operand.hbm [shape: bf16[128,128], index: 2, kind: input, shape index: {}]   ;;  %s2232_s3 = inlined_call_operand.hbm [shape: bf16[3,128,128], index: 3, kind: input, shape index: {}]   ;;  %s2233_s4 = inlined_call_operand.hbm [shape: f32[3,1,128], index: 4, kind: input, shape index: {}]   ;;  %s2234_s5 = inlined_call_operand.hbm [shape: f32[3,1,128], index: 5, kind: input, shape index: {}]   ;;  %s2235_s6 = inlined_call_operand.hbm [shape: f32[3,1,128], index: 6, kind: input, shape index: {}]   ;;  %s2236_s7 = inlined_call_operand.hbm [shape: f32[128,128], index: 7, kind: output, shape index: {}]  }
   0x1   :  { %2247 = sst [smem:[#allocation21_spill]] %s2230_s1 }
   0x2   :  { %12 = vsyncpa [#allocation4], 0 }
   0x3   :  { %13 = vsyncpa [#allocation7], 0 }
   0x4   :  { %14 = vsyncpa [#allocation10], 0 }
   0x5   :  { %15 = vsyncpa [#allocation13], 0 }
   0x6   :  { %16 = vsyncpa [#allocation5], 0  ;;  %s1847_s24 = smov 0   ;;  %s1849_s25 = smov 0  }
   0x7   :  { %s1851_s26 = smov 0  }
   0x8 LB: > { %s1791_s27 = smov [#allocation6]   ;;  %s2240_s29 = sadd.s32 4294967295, %s1789_s26   ;;  %s1789_s26 = sphi %s1851_s26, %s22_s26   ;;  %s1785_s25 = sphi %s1849_s25, %s2262_s25   ;;  %s1781_s24 = sphi %s1847_s24, %s2261_s24  }
   0x9   : > { %s240_s28 = sshll.u32 %s1791_s27, 4  ;;  %p1147_p0 = scmp.ge.s32.totalorder %s1789_s26, 1  ;;  %s1871_s28 = int_to_ptr.vmem [resolvable:$true] %s240_s28 }
   0xa   : > { %p212_p1 = scmp.lt.s32.totalorder %s1789_s26, 4  ;;  %p1867_p2 = scmp.eq.s32.totalorder %s2240_s29, 0 }
   0xb   : > { %s1792_s9 = smov [#allocation9]   ;;  %s1793_s12 = smov [#allocation12]  }
   0xc   : > { %s2248_s30 = scalar_select %p1867_p2, 1, 0 }
   0xd   : > { %p1873_p3 = pnand %p1147_p0, %p212_p1  ;;  %s266_s10 = sshll.u32 %s1792_s9, 4  ;;  %s1879_s10 = int_to_ptr.vmem [resolvable:$true] %s266_s10 }
   0xe   : > { %s1887_s13 = sshll.u32 %s1793_s12, 4  ;;  %s2251_s1 = sld [smem:[#allocation21_spill]]  ;;  %s293_s13 = int_to_ptr.vmem [resolvable:$true] %s1887_s13 }
   0xf   : > { %s2249_s8 = scalar_select %p1873_p3, 1, 0 }
  0x10   : > { %p1391_p4 = pneg %p1873_p3 }
  0x12   : > { %p1883_p5 = pnand %p1867_p2, %p1391_p4 }
  0x14   : > { %s1525_s16 = scalar_lea.hbm %s2251_s1, 1024  ;;  %p1897_p7 = pneg %p1883_p5 }
  0x15   : > { %p1526_p6 = scmp.ne.s32.totalorder %s2251_s1, %s1525_s16  ;;  %p1532_p10 = scmp.lt.u32.totalorder %s1525_s16, %s2251_s1 }
  0x17   : > { %p1528_p8 = pnand %p1897_p7, %p1526_p6 }
  0x19   : > { %p1529_p9 = pneg %p1528_p8 }
  0x1b   : > { %p1534_p11 = pnand %p1532_p10, %p1529_p9 }
  0x1d   : > { %1537 = shalt.err (!%p1534_p11)
}
  0x1e   : > { %s1538_s22 = scalar_lea.vmem %s1871_s28, 1024  ;;  %p1546_p1 = scmp.lt.s32.totalorder %s1871_s28, %s1871_s28 }
  0x1f   : > { %p1539_p12 = scmp.ne.s32.totalorder %s1871_s28, %s1538_s22  ;;  %p1547_p4 = scmp.lt.s32.totalorder %s1538_s22, %s1538_s22 }
  0x21   : > { %p1541_p13 = pnand %p1539_p12, %p1897_p7  ;;  %p1548_p6 = por %p1547_p4, %p1546_p1 }
  0x23   : > { %p1542_p0 = pneg %p1541_p13 }
  0x25   : > { %p1549_p8 = pnand %p1548_p6, %p1542_p0 }
  0x27   : > { %1552 = shalt.err (!%p1549_p8)
}
  0x28   : > { %s2245_s23 = smov 64   ;;  %s2246_s27 = smov 4  }
  0x29   : > { %1397 = dma.hbm_to_vmem [thread:$0]  (!%p1883_p5), %s2251_s1, 1024, %s1871_s28, [#allocation7], %s2245_s23, %s2245_s23, %s2246_s27  }
  0x2a   : > { %s1553_s16 = scalar_lea.hbm %s2232_s3, 3072 }
  0x2b   : > { %p1554_p9 = scmp.ne.s32.totalorder %s2232_s3, %s1553_s16  ;;  %p1560_p12 = scmp.lt.u32.totalorder %s1553_s16, %s2232_s3 }
  0x2d   : > { %p1556_p10 = pnand %p1554_p9, %p1897_p7 }
  0x2f   : > { %p1557_p11 = pneg %p1556_p10 }
  0x31   : > { %p1562_p13 = pnand %p1560_p12, %p1557_p11 }
  0x33   : > { %1565 = shalt.err (!%p1562_p13)
}
  0x34   : > { %s1566_s28 = scalar_lea.vmem %s1879_s10, 3072  ;;  %p1574_p6 = scmp.lt.s32.totalorder %s1879_s10, %s1879_s10 }
  0x35   : > { %p1567_p0 = scmp.ne.s32.totalorder %s1879_s10, %s1566_s28  ;;  %p1575_p8 = scmp.lt.s32.totalorder %s1566_s28, %s1566_s28 }
  0x37   : > { %p1569_p1 = pnand %p1567_p0, %p1897_p7  ;;  %p1576_p9 = por %p1575_p8, %p1574_p6 }
  0x39   : > { %p1570_p4 = pneg %p1569_p1 }
  0x3b   : > { %p1577_p10 = pnand %p1576_p9, %p1570_p4 }
  0x3d   : > { %1580 = shalt.err (!%p1577_p10)
}
  0x3e   : > { %1403 = dma.hbm_to_vmem [thread:$0]  (!%p1883_p5), %s2232_s3, 3072, %s1879_s10, [#allocation10], %s2245_s23, %s2245_s23, %s2246_s27  }
  0x3f   : > { %s1581_s15 = scalar_lea.hbm %s2234_s5, 48 }
  0x40   : > { %p1582_p11 = scmp.ne.s32.totalorder %s2234_s5, %s1581_s15  ;;  %p1588_p0 = scmp.lt.u32.totalorder %s1581_s15, %s2234_s5 }
  0x42   : > { %p1584_p12 = pnand %p1582_p11, %p1897_p7 }
  0x44   : > { %p1585_p13 = pneg %p1584_p12 }
  0x46   : > { %p1590_p1 = pnand %p1588_p0, %p1585_p13 }
  0x48   : > { %1593 = shalt.err (!%p1590_p1)
}
  0x49   : > { %s1594_s21 = scalar_lea.vmem %s293_s13, 48  ;;  %s1601_s10 = scalar_lea.vmem %s293_s13, 64 }
  0x4a   : > { %p1595_p4 = scmp.ne.s32.totalorder %s293_s13, %s1594_s21  ;;  %p1602_p9 = scmp.lt.s32.totalorder %s293_s13, %s293_s13 }
  0x4b   : > { %p1603_p10 = scmp.lt.s32.totalorder %s1601_s10, %s1594_s21 }
  0x4c   : > { %p1597_p6 = pnand %p1595_p4, %p1897_p7 }
  0x4d   : > { %p1604_p2 = por %p1603_p10, %p1602_p9 }
  0x4e   : > { %p1598_p8 = pneg %p1597_p6 }
  0x50   : > { %p1605_p3 = pnand %p1604_p2, %p1598_p8 }
  0x52   : > { %1608 = shalt.err (!%p1605_p3)
}
  0x53   : > { %s2241_s28 = smov 16   ;;  %s2243_s22 = smov 1  }
  0x54   : > { %1409 = dma.hbm_to_vmem [thread:$0]  (!%p1883_p5), %s2234_s5, 48, %s293_s13, [#allocation13], %s2241_s28, %s2241_s28, %s2243_s22  }
  0x55   : > { %s34_s14 = sadd.s32 1, %s1785_s25  ;;  %s1798_s15 = smov [#allocation3]  }
  0x56   : > { %p36_p11 = scmp.ge.s32.totalorder %s34_s14, 3  ;;  %s227_s16 = sshll.u32 %s1798_s15, 4  ;;  %s228_s16 = int_to_ptr.vmem [resolvable:$true] %s227_s16 }
  0x57   : > { %s1609_s20 = scalar_lea.hbm %s2229_s0, 2048 }
  0x58   : > { %s2264_s14 = smov (%p36_p11, %s34_s14), 0  ;;  %p1610_p2 = scmp.ne.s32.totalorder %s2229_s0, %s1609_s20 }
  0x59   : > { %p1616_p13 = scmp.lt.u32.totalorder %s1609_s20, %s2229_s0 }
  0x5a   : > { %p1612_p3 = pnand %p1610_p2, %p1897_p7 }
  0x5c   : > { %p1613_p12 = pneg %p1612_p3 }
  0x5e   : > { %p1618_p0 = pnand %p1616_p13, %p1613_p12 }
  0x60   : > { %1621 = shalt.err (!%p1618_p0)
}
  0x61   : > { %s1622_s12 = scalar_lea.vmem %s228_s16, 2048  ;;  %p1630_p8 = scmp.lt.s32.totalorder %s228_s16, %s228_s16 }
  0x62   : > { %p1623_p1 = scmp.ne.s32.totalorder %s228_s16, %s1622_s12  ;;  %p1631_p9 = scmp.lt.s32.totalorder %s1622_s12, %s1622_s12 }
  0x64   : > { %p1625_p4 = pnand %p1623_p1, %p1897_p7  ;;  %p1632_p10 = por %p1631_p9, %p1630_p8 }
  0x66   : > { %p1626_p6 = pneg %p1625_p4 }
  0x68   : > { %p1633_p11 = pnand %p1632_p10, %p1626_p6 }
  0x6a   : > { %1636 = shalt.err (!%p1633_p11)
}
  0x6b   : > { %s1799_s15 = smov 128   ;;  %s1800_s17 = smov 8  }
  0x6c   : > { %1394 = dma.hbm_to_vmem [thread:$0]  (!%p1883_p5), %s2229_s0, 2048, %s228_s16, [#allocation4], %s1799_s15, %s1799_s15, %s1800_s17  }
  0x6d   : > { %s1801_s21 = smov [#allocation8]   ;;  %s1802_s9 = smov [#allocation11]  }
  0x6e   : > { %s253_s10 = sshll.u32 %s1801_s21, 4  ;;  %s279_s13 = sshll.u32 %s1802_s9, 4  ;;  %s254_s10 = int_to_ptr.vmem [resolvable:$true] %s253_s10  ;;  %s280_s13 = int_to_ptr.vmem [resolvable:$true] %s279_s13 }
  0x6f   : > { %s1637_s12 = scalar_lea.hbm %s2231_s2, 1024 }
  0x70   : > { %p1638_p2 = scmp.ne.s32.totalorder %s2231_s2, %s1637_s12  ;;  %p1644_p13 = scmp.lt.u32.totalorder %s1637_s12, %s2231_s2 }
  0x72   : > { %p1640_p3 = pnand %p1638_p2, %p1897_p7 }
  0x74   : > { %p1641_p12 = pneg %p1640_p3 }
  0x76   : > { %p1646_p0 = pnand %p1644_p13, %p1641_p12 }
  0x78   : > { %1649 = shalt.err (!%p1646_p0)
}
  0x79   : > { %s1650_s16 = scalar_lea.vmem %s254_s10, 1024  ;;  %p1658_p8 = scmp.lt.s32.totalorder %s254_s10, %s254_s10 }
  0x7a   : > { %p1651_p1 = scmp.ne.s32.totalorder %s254_s10, %s1650_s16  ;;  %p1659_p9 = scmp.lt.s32.totalorder %s1650_s16, %s1650_s16 }
  0x7c   : > { %p1653_p4 = pnand %p1651_p1, %p1897_p7  ;;  %p1660_p10 = por %p1659_p9, %p1658_p8 }
  0x7e   : > { %p1654_p6 = pneg %p1653_p4 }
  0x80   : > { %p1661_p11 = pnand %p1660_p10, %p1654_p6 }
  0x82   : > { %1664 = shalt.err (!%p1661_p11)
}
  0x83   : > { %s2253_s29 = smov 4   ;;  %s2254_s23 = smov 64  }
  0x84   : > { %1400 = dma.hbm_to_vmem [thread:$0]  (!%p1883_p5), %s2231_s2, 1024, %s254_s10, [#allocation7], %s2254_s23, %s2254_s23, %s2253_s29  }
  0x85   : > { %s1665_s15 = scalar_lea.hbm %s2233_s4, 48 }
  0x86   : > { %p1666_p2 = scmp.ne.s32.totalorder %s2233_s4, %s1665_s15  ;;  %p1672_p13 = scmp.lt.u32.totalorder %s1665_s15, %s2233_s4 }
  0x88   : > { %p1668_p3 = pnand %p1666_p2, %p1897_p7 }
  0x8a   : > { %p1669_p12 = pneg %p1668_p3 }
  0x8c   : > { %p1674_p0 = pnand %p1672_p13, %p1669_p12 }
  0x8e   : > { %1677 = shalt.err (!%p1674_p0)
}
  0x8f   : > { %s1678_s9 = scalar_lea.vmem %s280_s13, 48  ;;  %s1685_s10 = scalar_lea.vmem %s280_s13, 64 }
  0x90   : > { %p1679_p1 = scmp.ne.s32.totalorder %s280_s13, %s1678_s9  ;;  %p1686_p8 = scmp.lt.s32.totalorder %s280_s13, %s280_s13 }
  0x91   : > { %p1687_p9 = scmp.lt.s32.totalorder %s1685_s10, %s1678_s9 }
  0x92   : > { %p1681_p4 = pnand %p1679_p1, %p1897_p7 }
  0x93   : > { %p1688_p10 = por %p1687_p9, %p1686_p8 }
  0x94   : > { %p1682_p6 = pneg %p1681_p4 }
  0x96   : > { %p1689_p11 = pnand %p1688_p10, %p1682_p6 }
  0x98   : > { %1692 = shalt.err (!%p1689_p11)
}
  0x99   : > { %s2255_s12 = smov 1   ;;  %s2256_s16 = smov 16  }
  0x9a   : > { %1406 = dma.hbm_to_vmem [thread:$0]  (!%p1883_p5), %s2233_s4, 48, %s280_s13, [#allocation10], %s2256_s16, %s2256_s16, %s2255_s12  }
  0x9b   : > { %s1803_s1 = smov [#allocation14]   ;;  %s1693_s15 = scalar_lea.hbm %s2235_s6, 48 }
  0x9c   : > { %s305_s27 = sshll.u32 %s1803_s1, 4  ;;  %p1694_p2 = scmp.ne.s32.totalorder %s2235_s6, %s1693_s15  ;;  %s306_s27 = int_to_ptr.vmem [resolvable:$true] %s305_s27 }
  0x9d   : > { %p1700_p13 = scmp.lt.u32.totalorder %s1693_s15, %s2235_s6 }
  0x9e   : > { %p1696_p3 = pnand %p1694_p2, %p1897_p7 }
  0xa0   : > { %p1697_p12 = pneg %p1696_p3 }
  0xa2   : > { %p1702_p0 = pnand %p1700_p13, %p1697_p12 }
  0xa4   : > { %1705 = shalt.err (!%p1702_p0)
}
  0xa5   : > { %s1706_s13 = scalar_lea.vmem %s306_s27, 48  ;;  %s1713_s9 = scalar_lea.vmem %s306_s27, 64 }
  0xa6   : > { %p1707_p1 = scmp.ne.s32.totalorder %s306_s27, %s1706_s13  ;;  %p1714_p8 = scmp.lt.s32.totalorder %s306_s27, %s306_s27 }
  0xa7   : > { %p1715_p9 = scmp.lt.s32.totalorder %s1713_s9, %s1706_s13 }
  0xa8   : > { %p1709_p4 = pnand %p1707_p1, %p1897_p7 }
  0xa9   : > { %p1716_p10 = por %p1715_p9, %p1714_p8 }
  0xaa   : > { %p1710_p6 = pneg %p1709_p4 }
  0xac   : > { %p1717_p11 = pnand %p1716_p10, %p1710_p6 }
  0xae   : > { %1720 = shalt.err (!%p1717_p11)
}
  0xaf   : > { %1412 = dma.hbm_to_vmem [thread:$0]  (!%p1883_p5), %s2235_s6, 48, %s306_s27, [#allocation13], %s2256_s16, %s2256_s16, %s2255_s12  }
  0xb0   : > { %p2257_p2 = scmp.ne.s32.totalorder %s2249_s8, 0 }
  0xb1   : > { %p2258_p7 = scmp.ne.s32.totalorder (!%p2257_p2), %s2248_s30, 0 }
  0xb2   : > { %321 = sbr.rel (%p2257_p2) target bundleno = 788 (0x314), region = 48 }
  0xb9   : > { %1760 = dma.done.wait (%p2258_p7), [#allocation4], 2048  }
  0xba   : > { %1762 = vsyncadd (%p2258_p7), [#allocation4], 4294965248 }
  0xbb   : > { %1764 = dma.done.wait (%p2258_p7), [#allocation7], 2048  }
  0xbc   : > { %1766 = vsyncadd (%p2258_p7), [#allocation7], 4294965248 }
  0xbd   : > { %1768 = dma.done.wait (%p2258_p7), [#allocation10], 3120  }
  0xbe   : > { %1770 = vsyncadd (%p2258_p7), [#allocation10], 4294964176 }
  0xbf   : > { %1772 = dma.done.wait (%p2258_p7), [#allocation13], 96  }
  0xc0   : > { %1774 = vsyncadd (%p2258_p7), [#allocation13], 4294967200  ;;  %p370_p5 = scmp.eq.s32.totalorder %s1781_s24, 0 }
  0xc1   : > { %v1469_v0 = vld [vmem:[#allocation6] sm:$0xff] (%p370_p5)   ;;  %v1470_v1 = vld [vmem:[#allocation6 + $0x8] sm:$0xff] (%p370_p5)   ;;  %v1471_v2 = vld [vmem:[#allocation6 + $0x10] sm:$0xff] (%p370_p5)  }
  0xc2   : > { %375 = sbr.rel (!%p370_p5) target bundleno = 201 (0xc9), region = 80  ;;  %440 = vst [vmem:[#allocation2] sm:$0xff] (%p370_p5), %v1469_v0  ;;  %441 = vst [vmem:[#allocation2 + $0x8] sm:$0xff] (%p370_p5), %v1470_v1  ;;  %v1472_v3 = vld [vmem:[#allocation6 + $0x18] sm:$0xff] (%p370_p5)   ;;  %v1473_v4 = vld [vmem:[#allocation6 + $0x20] sm:$0xff] (%p370_p5)  }
  0xc3   : > { %442 = vst [vmem:[#allocation2 + $0x10] sm:$0xff] (%p370_p5), %v1471_v2  ;;  %443 = vst [vmem:[#allocation2 + $0x18] sm:$0xff] (%p370_p5), %v1472_v3  ;;  %v1474_v5 = vld [vmem:[#allocation6 + $0x28] sm:$0xff] (%p370_p5)   ;;  %v1475_v6 = vld [vmem:[#allocation6 + $0x30] sm:$0xff] (%p370_p5)  }
  0xc4   : > { %444 = vst [vmem:[#allocation2 + $0x20] sm:$0xff] (%p370_p5), %v1473_v4  ;;  %445 = vst [vmem:[#allocation2 + $0x28] sm:$0xff] (%p370_p5), %v1474_v5  ;;  %v1476_v7 = vld [vmem:[#allocation6 + $0x38] sm:$0xff] (%p370_p5)  }
  0xc5   : > { %446 = vst [vmem:[#allocation2 + $0x30] sm:$0xff] (%p370_p5), %v1475_v6  ;;  %447 = vst [vmem:[#allocation2 + $0x38] sm:$0xff] (%p370_p5), %v1476_v7 }
  0xc9 PF: > { %p1172_p3 = scmp.ne.s32.totalorder %s1781_s24, 0 }
  0xca   : > { %v451_v8 = vld [vmem:[#allocation3] sm:$0xff] (!%p1172_p3)  ;;  %v452_v9 = vld [vmem:[#allocation3 + $0x8] sm:$0xff] (!%p1172_p3)  ;;  %v453_v10 = vld [vmem:[#allocation3 + $0x10] sm:$0xff] (!%p1172_p3) }
  0xcb   : > { %450 = sbr.rel (%p1172_p3) target bundleno = 211 (0xd3), region = 84  ;;  %468 = vst [vmem:[#allocation15] sm:$0xff] (!%p1172_p3), %v451_v8  ;;  %469 = vst [vmem:[#allocation15 + $0x8] sm:$0xff] (!%p1172_p3), %v452_v9  ;;  %v454_v11 = vld [vmem:[#allocation3 + $0x18] sm:$0xff] (!%p1172_p3)  ;;  %v455_v12 = vld [vmem:[#allocation3 + $0x20] sm:$0xff] (!%p1172_p3) }
  0xcc   : > { %470 = vst [vmem:[#allocation15 + $0x10] sm:$0xff] (!%p1172_p3), %v453_v10  ;;  %v456_v13 = vld [vmem:[#allocation3 + $0x28] sm:$0xff] (!%p1172_p3)  ;;  %471 = vst [vmem:[#allocation15 + $0x18] sm:$0xff] (!%p1172_p3), %v454_v11  ;;  %v457_v14 = vld [vmem:[#allocation3 + $0x30] sm:$0xff] (!%p1172_p3) }
  0xcd   : > { %472 = vst [vmem:[#allocation15 + $0x20] sm:$0xff] (!%p1172_p3), %v455_v12  ;;  %473 = vst [vmem:[#allocation15 + $0x28] sm:$0xff] (!%p1172_p3), %v456_v13  ;;  %v458_v15 = vld [vmem:[#allocation3 + $0x38] sm:$0xff] (!%p1172_p3)  ;;  %v459_v16 = vld [vmem:[#allocation3 + $0x40] sm:$0xff] (!%p1172_p3) }
  0xce   : > { %474 = vst [vmem:[#allocation15 + $0x30] sm:$0xff] (!%p1172_p3), %v457_v14  ;;  %475 = vst [vmem:[#allocation15 + $0x38] sm:$0xff] (!%p1172_p3), %v458_v15  ;;  %v460_v17 = vld [vmem:[#allocation3 + $0x48] sm:$0xff] (!%p1172_p3)  ;;  %v461_v18 = vld [vmem:[#allocation3 + $0x50] sm:$0xff] (!%p1172_p3) }
  0xcf   : > { %476 = vst [vmem:[#allocation15 + $0x40] sm:$0xff] (!%p1172_p3), %v459_v16  ;;  %v462_v19 = vld [vmem:[#allocation3 + $0x58] sm:$0xff] (!%p1172_p3)  ;;  %477 = vst [vmem:[#allocation15 + $0x48] sm:$0xff] (!%p1172_p3), %v460_v17  ;;  %v463_v20 = vld [vmem:[#allocation3 + $0x60] sm:$0xff] (!%p1172_p3) }
  0xd0   : > { %478 = vst [vmem:[#allocation15 + $0x50] sm:$0xff] (!%p1172_p3), %v461_v18  ;;  %479 = vst [vmem:[#allocation15 + $0x58] sm:$0xff] (!%p1172_p3), %v462_v19  ;;  %v464_v21 = vld [vmem:[#allocation3 + $0x68] sm:$0xff] (!%p1172_p3)  ;;  %v465_v22 = vld [vmem:[#allocation3 + $0x70] sm:$0xff] (!%p1172_p3) }
  0xd1   : > { %480 = vst [vmem:[#allocation15 + $0x60] sm:$0xff] (!%p1172_p3), %v463_v20  ;;  %481 = vst [vmem:[#allocation15 + $0x68] sm:$0xff] (!%p1172_p3), %v464_v21  ;;  %v466_v23 = vld [vmem:[#allocation3 + $0x78] sm:$0xff] (!%p1172_p3) }
  0xd2   : > { %482 = vst [vmem:[#allocation15 + $0x70] sm:$0xff] %v465_v22  ;;  %483 = vst [vmem:[#allocation15 + $0x78] sm:$0xff] %v466_v23 }
  0xd3 PF: > { %p504_p12 = scmp.lt.s32.totalorder %s1781_s24, 0  ;;  %s505_s30 = ssub.s32 0, %s1781_s24  ;;  %v1477_v24 = vld [vmem:[#allocation8] sm:$0xff]   ;;  %v1479_v34 = vld [vmem:[#allocation8 + $0x8] sm:$0xff]   ;;  %v1481_v36 = vld [vmem:[#allocation8 + $0x10] sm:$0xff]  }
  0xd4   : > { %s1173_s8 = smin.u32 %s1781_s24, %s505_s30  ;;  %v1478_v25 = vld [vmem:[#allocation8 + $0x20] sm:$0xff]   ;;  %1279 = vmatprep.mubr.bf16.mxu0 %v1477_v24  ;;  %v1480_v35 = vld [vmem:[#allocation8 + $0x28] sm:$0xff]   ;;  %v1482_v37 = vld [vmem:[#allocation8 + $0x30] sm:$0xff]   ;;  %s793_s1 = sadd.s32 1, %s1781_s24 }
  0xd5   : > { %s507_s11 = sand.u32 1, %s1173_s8   ;;  %1287 = vmatprep.mubr.bf16.mxu1 %v1478_v25  ;;  %v1483_v38 = vld [vmem:[#allocation8 + $0x18] sm:$0xff]   ;;  %s527_s27 = scalar_lea.vmem [#allocation11], %s1781_s24  ;;  %v697_v7 = vld [vmem:[#allocation15] sm:$0xff]  ;;  %v700_v16 = vld [vmem:[#allocation15 + $0x18] sm:$0xff] }
  0xd6   : > { %s508_s19 = ssub.s32 0, %s507_s11  ;;  %v1484_v39 = vld [vmem:[#allocation8 + $0x38] sm:$0xff]   ;;  %v1178_v40 = vld [vmem:[%s527_s27] ss:$0 sm:$0xff]  ;;  %s713_s28 = scalar_lea.vmem [#allocation14], %s1781_s24 }
  0xd7   : > { %s2266_s19 = smov (!%p504_p12, %s508_s19), %s507_s11  ;;  %v699_v59 = vld [vmem:[#allocation15 + $0x10] sm:$0xff]  ;;  %s737_s22 = scalar_lea.vmem [#allocation12], %s1781_s24  ;;  %v705_v12 = vld [vmem:[#allocation15 + $0x40] sm:$0xff] }
  0xd8   : > { %p1175_p13 = scmp.lt.s32.totalorder %s2266_s19, 0  ;;  %s514_s12 = sadd.s32 2, %s2266_s19  ;;  %v2092_v60 = vld [vmem:[%s713_s28] ss:$0 sm:$0xff]  ;;  %v708_v21 = vld [vmem:[#allocation15 + $0x58] sm:$0xff] }
  0xd9   : > { %v707_v1 = vld [vmem:[#allocation15 + $0x50] sm:$0xff]  ;;  %v723_v11 = vmul.f32 %v2092_v60, %v699_v59  ;;  %v721_v20 = vmul.f32 %v2092_v60, %v697_v7  ;;  %v729_v25 = vmul.f32 %v2092_v60, %v705_v12  ;;  %p1189_p0 = scmp.ge.s32.totalorder %s793_s1, 3 }
  0xda   : > { %s2268_s12 = smov (!%p1175_p13, %s514_s12), %s2266_s19  ;;  %v2095_v6 = vld [vmem:[%s737_s22] ss:$0 sm:$0xff]  ;;  %v731_v15 = vmul.f32 %v2092_v60, %v707_v1  ;;  %s1190_s15 = sshll.u32 (!%p1189_p0), %s1781_s24, 6 }
  0xdb   : > { %s1230_s16 = sshll.u32 %s2268_s12, 6  ;;  %s2170_s17 = scalar_lea.vmem (!%p1189_p0), [#allocation9], %s1190_s15 }
  0xdc   : > { %s2079_s23 = scalar_lea.vmem [#allocation2], %s1230_s16  ;;  %p1215_p1 = scmp.ne.s32.totalorder (!%p1189_p0), %s2268_s12, 0 }
  0xdd   : > { %v519_v26 = vld [vmem:[%s2079_s23] sm:$0xff]  ;;  %v520_v27 = vld [vmem:[%s2079_s23 + $0x8] sm:$0xff]  ;;  %v521_v28 = vld [vmem:[%s2079_s23 + $0x10] sm:$0xff] }
  0xde   : > { %1263 = vmatprep.subr.bf16.mxu0 %v519_v26  ;;  %1327 = vmatprep.subr.bf16.mxu1 %v519_v26  ;;  %v522_v29 = vld [vmem:[%s2079_s23 + $0x18] sm:$0xff]  ;;  %v523_v30 = vld [vmem:[%s2079_s23 + $0x20] sm:$0xff]  ;;  %v524_v31 = vld [vmem:[%s2079_s23 + $0x28] sm:$0xff] }
  0xdf   : > { %1264 = vmatpush3.bf16.msra.mxu0 %v519_v26  ;;  %1335 = vmatpush3.bf16.msra.mxu1 %v519_v26  ;;  %v525_v32 = vld [vmem:[%s2079_s23 + $0x30] sm:$0xff]  ;;  %v526_v33 = vld [vmem:[%s2079_s23 + $0x38] sm:$0xff] }
  0xe0   : > { %1265 = vmatprep.subr.bf16.mxu0 %v520_v27  ;;  %1328 = vmatprep.subr.bf16.mxu1 %v520_v27  ;;  %v698_v26 = vld [vmem:[#allocation15 + $0x8] sm:$0xff] }
  0xe3   : > { %1266 = vmatpush3.bf16.msra.mxu0 %v520_v27  ;;  %1336 = vmatpush3.bf16.msra.mxu1 %v520_v27 }
  0xe4   : > { %1267 = vmatprep.subr.bf16.mxu0 %v521_v28  ;;  %1329 = vmatprep.subr.bf16.mxu1 %v521_v28 }
  0xe7   : > { %1268 = vmatpush3.bf16.msra.mxu0 %v521_v28  ;;  %1337 = vmatpush3.bf16.msra.mxu1 %v521_v28 }
  0xe8   : > { %1269 = vmatprep.subr.bf16.mxu0 %v522_v29  ;;  %1330 = vmatprep.subr.bf16.mxu1 %v522_v29 }
  0xeb   : > { %1270 = vmatpush3.bf16.msra.mxu0 %v522_v29  ;;  %1338 = vmatpush3.bf16.msra.mxu1 %v522_v29 }
  0xec   : > { %1271 = vmatprep.subr.bf16.mxu0 %v523_v30  ;;  %1331 = vmatprep.subr.bf16.mxu1 %v523_v30 }
  0xef   : > { %1272 = vmatpush3.bf16.msra.mxu0 %v523_v30  ;;  %1339 = vmatpush3.bf16.msra.mxu1 %v523_v30  ;;  %v724_v30 = vmul.f32 %v2092_v60, %v700_v16 }
  0xf0   : > { %1273 = vmatprep.subr.bf16.mxu0 %v524_v31  ;;  %1332 = vmatprep.subr.bf16.mxu1 %v524_v31 }
  0xf3   : > { %1274 = vmatpush3.bf16.msra.mxu0 %v524_v31  ;;  %1340 = vmatpush3.bf16.msra.mxu1 %v524_v31  ;;  %v706_v31 = vld [vmem:[#allocation15 + $0x48] sm:$0xff] }
  0xf4   : > { %1275 = vmatprep.subr.bf16.mxu0 %v525_v32  ;;  %1333 = vmatprep.subr.bf16.mxu1 %v525_v32 }
  0xf7   : > { %1276 = vmatpush3.bf16.msra.mxu0 %v525_v32  ;;  %1341 = vmatpush3.bf16.msra.mxu1 %v525_v32 }
  0xf8   : > { %1277 = vmatprep.subr.bf16.mxu0 %v526_v33  ;;  %1334 = vmatprep.subr.bf16.mxu1 %v526_v33 }
  0xfb   : > { %1278 = vmatpush3.bf16.msra.mxu0 %v526_v33  ;;  %1342 = vmatpush3.bf16.msra.mxu1 %v526_v33 }
  0xfe   : > { %1280 = vmatmul.mubr.bf16.vlgmr.msra.gmra.mrb[0].mxu0 %v1479_v34  ;;  %1288 = vmatmul.mubr.bf16.vlgmr.msra.gmra.mrb[0].mxu1 %v1480_v35  ;;  %v732_v35 = vmul.f32 %v2092_v60, %v708_v21 }
  0xff   : > { %1283 = vmatprep.mubr.bf16.mxu0 %v1481_v36  ;;  %1291 = vmatprep.mubr.bf16.mxu1 %v1482_v37  ;;  %v703_v36 = vld [vmem:[#allocation15 + $0x30] sm:$0xff] }
 0x106   : > { %1284 = vmatmul.mubr.bf16.gmra.mrb[4].mxu0 %v1483_v38  ;;  %1292 = vmatmul.mubr.bf16.gmra.mrb[4].mxu1 %v1484_v39 }
 0x1d1   : > { %v1281_v41 = vpop.f32.mrb[0].mxu0  ;;  %v1289_v42 = vpop.f32.mrb[0].mxu1 }
 0x1d2   : > { %v626_v43 = vadd.f32 %v1281_v41, %v1178_v40  ;;  %v658_v44 = vadd.f32 %v1289_v42, %v1178_v40  ;;  %v617_v45 = vpop.f32.mrb[1].mxu0  ;;  %v649_v46 = vpop.f32.mrb[1].mxu1  ;;  %v711_v41 = vld [vmem:[#allocation15 + $0x70] sm:$0xff] }
 0x1d3   : > { %v618_v47 = vadd.f32 %v1178_v40, %v617_v45  ;;  %v650_v48 = vadd.f32 %v1178_v40, %v649_v46  ;;  %v1282_v49 = vpop.f32.mrb[2].mxu0  ;;  %v1290_v50 = vpop.f32.mrb[2].mxu1  ;;  %v730_v45 = vmul.f32 %v2092_v60, %v706_v31  ;;  %v701_v46 = vld [vmem:[#allocation15 + $0x20] sm:$0xff] }
 0x1d4   : > { %1485 = vtanh.f32 %v626_v43  ;;  %v629_v51 = vadd.f32 %v1282_v49, %v1178_v40  ;;  %v620_v52 = vpop.f32.mrb[3].mxu0  ;;  %v652_v53 = vpop.f32.mrb[3].mxu1  ;;  %v661_v54 = vadd.f32 %v1290_v50, %v1178_v40  ;;  %v727_v50 = vmul.f32 %v2092_v60, %v703_v36  ;;  %v1518_v31 = vld [vmem:[%s2170_s17 + $0x48] sm:$0xff] (!%p1189_p0)  }
 0x1d5   : > { %1487 = vtanh.f32 %v658_v44  ;;  %v621_v55 = vadd.f32 %v1178_v40, %v620_v52  ;;  %v653_v56 = vadd.f32 %v1178_v40, %v652_v53  ;;  %v1522_v36 = vld [vmem:[%s2170_s17 + $0x68] sm:$0xff] (!%p1189_p0)  }
 0x1d6   : > { %1489 = vtanh.f32 %v618_v47 }
 0x1d7   : > { %1491 = vtanh.f32 %v650_v48 }
 0x1d8   : > { %1493 = vtanh.f32 %v629_v51  ;;  %v709_v51 = vld [vmem:[#allocation15 + $0x60] sm:$0xff] }
 0x1d9   : > { %1495 = vtanh.f32 %v661_v54  ;;  %v1285_v57 = vpop.f32.mrb[4].mxu0  ;;  %v1293_v58 = vpop.f32.mrb[4].mxu1 }
 0x1da   : > { %1497 = vtanh.f32 %v621_v55  ;;  %v642_v61 = vadd.f32 %v1285_v57, %v1178_v40  ;;  %v674_v62 = vadd.f32 %v1293_v58, %v1178_v40  ;;  %v633_v63 = vpop.f32.mrb[5].mxu0  ;;  %v665_v0 = vpop.f32.mrb[5].mxu1  ;;  %v735_v55 = vmul.f32 %v2092_v60, %v711_v41 }
 0x1db   : > { %1499 = vtanh.f32 %v653_v56  ;;  %v634_v2 = vadd.f32 %v1178_v40, %v633_v63  ;;  %v666_v3 = vadd.f32 %v1178_v40, %v665_v0  ;;  %v1286_v4 = vpop.f32.mrb[6].mxu0  ;;  %v1294_v5 = vpop.f32.mrb[6].mxu1  ;;  %v704_v56 = vld [vmem:[#allocation15 + $0x38] sm:$0xff] }
 0x1dc   : > { %1501 = vtanh.f32 %v642_v61  ;;  %v645_v8 = vadd.f32 %v1286_v4, %v1178_v40  ;;  %v636_v9 = vpop.f32.mrb[7].mxu0  ;;  %v668_v10 = vpop.f32.mrb[7].mxu1  ;;  %v677_v13 = vadd.f32 %v1294_v5, %v1178_v40  ;;  %v725_v61 = vmul.f32 %v2092_v60, %v701_v46 }
 0x1dd   : > { %1503 = vtanh.f32 %v674_v62  ;;  %v637_v17 = vadd.f32 %v1178_v40, %v636_v9  ;;  %v669_v22 = vadd.f32 %v1178_v40, %v668_v10  ;;  %v722_v40 = vmul.f32 %v2092_v60, %v698_v26  ;;  %v712_v62 = vld [vmem:[#allocation15 + $0x78] sm:$0xff]  ;;  %v710_v9 = vld [vmem:[#allocation15 + $0x68] sm:$0xff] }
 0x1de   : > { %v1486_v14 = vpop.eup %1485  ;;  %1505 = vtanh.f32 %v634_v2  ;;  %v733_v2 = vmul.f32 %v2092_v60, %v709_v51  ;;  %v734_v21 = vmul.f32 %v2092_v60, %v710_v9 }
 0x1df   : > { %v1488_v18 = vpop.eup %1487  ;;  %v747_v19 = vmul.f32 %v1486_v14, %v2095_v6  ;;  %1507 = vtanh.f32 %v666_v3  ;;  %v702_v3 = vld [vmem:[#allocation15 + $0x28] sm:$0xff] }
 0x1e0   : > { %v1490_v23 = vpop.eup %1489  ;;  %v755_v24 = vmul.f32 %v1488_v18, %v2095_v6  ;;  %1509 = vtanh.f32 %v645_v8  ;;  %v728_v8 = vmul.f32 %v2092_v60, %v704_v56 }
 0x1e1   : > { %v1492_v27 = vpop.eup %1491  ;;  %v2103_v28 = vadd.f32 %v747_v19, %v723_v11  ;;  %v745_v29 = vmul.f32 %v1490_v23, %v2095_v6  ;;  %1511 = vtanh.f32 %v677_v13  ;;  %v736_v13 = vmul.f32 %v2092_v60, %v712_v62 }
 0x1e2   : > { %v1494_v32 = vpop.eup %1493  ;;  %v2107_v33 = vadd.f32 %v755_v24, %v731_v15  ;;  %v753_v34 = vmul.f32 %v1492_v27, %v2095_v6  ;;  %1513 = vtanh.f32 %v637_v17  ;;  %v726_v17 = vmul.f32 %v2092_v60, %v702_v3 }
 0x1e3   : > { %v1496_v37 = vpop.eup %1495  ;;  %779 = vst [vmem:[#allocation15 + $0x10] sm:$0xff] %v2103_v28  ;;  %v2112_v38 = vadd.f32 %v745_v29, %v721_v20  ;;  %v748_v39 = vmul.f32 %v1494_v32, %v2095_v6  ;;  %1515 = vtanh.f32 %v669_v22  ;;  %v1519_v32 = vld [vmem:[%s2170_s17 + $0x50] sm:$0xff] (!%p1189_p0)  }
 0x1e4   : > { %v1498_v42 = vpop.eup %1497  ;;  %787 = vst [vmem:[#allocation15 + $0x50] sm:$0xff] %v2107_v33  ;;  %v2117_v43 = vadd.f32 %v753_v34, %v729_v25  ;;  %v756_v44 = vmul.f32 %v1496_v37, %v2095_v6  ;;  %v1520_v34 = vld [vmem:[%s2170_s17 + $0x58] sm:$0xff] (!%p1189_p0)   ;;  %v1523_v37 = vld [vmem:[%s2170_s17 + $0x70] sm:$0xff] (!%p1189_p0)  }
 0x1e5   : > { %v1500_v47 = vpop.eup %1499  ;;  %777 = vst [vmem:[#allocation15] sm:$0xff] %v2112_v38  ;;  %v2122_v48 = vadd.f32 %v748_v39, %v724_v30  ;;  %v746_v49 = vmul.f32 %v1498_v42, %v2095_v6 }
 0x1e6   : > { %v1502_v52 = vpop.eup %1501  ;;  %785 = vst [vmem:[#allocation15 + $0x40] sm:$0xff] %v2117_v43  ;;  %v2127_v53 = vadd.f32 %v756_v44, %v732_v35  ;;  %v754_v54 = vmul.f32 %v1500_v47, %v2095_v6  ;;  %v1521_v35 = vld [vmem:[%s2170_s17 + $0x60] sm:$0xff] (!%p1189_p0)  }
 0x1e7   : > { %v1504_v57 = vpop.eup %1503  ;;  %780 = vst [vmem:[#allocation15 + $0x18] sm:$0xff] %v2122_v48  ;;  %v762_v58 = vadd.f32 %v746_v49, %v722_v40  ;;  %v751_v59 = vmul.f32 %v1502_v52, %v2095_v6  ;;  %v799_v39 = vpack.c.bf16 (!%p1189_p0), %v2122_v48, %v2103_v28 }
 0x1e8   : > { %v1506_v63 = vpop.eup %1505  ;;  %788 = vst [vmem:[#allocation15 + $0x58] sm:$0xff] %v2127_v53  ;;  %v770_v0 = vadd.f32 %v754_v54, %v730_v45  ;;  %v759_v1 = vmul.f32 %v1504_v57, %v2095_v6  ;;  %v803_v40 = vpack.c.bf16 (!%p1189_p0), %v2127_v53, %v2107_v33 }
 0x1e9   : > { %v1508_v4 = vpop.eup %1507  ;;  %778 = vst [vmem:[#allocation15 + $0x8] sm:$0xff] %v762_v58  ;;  %v2137_v5 = vadd.f32 %v751_v59, %v727_v50  ;;  %v749_v7 = vmul.f32 %v1506_v63, %v2095_v6  ;;  %v798_v60 = vpack.c.bf16 (!%p1189_p0), %v762_v58, %v2112_v38  ;;  %v1524_v38 = vld [vmem:[%s2170_s17 + $0x78] sm:$0xff] (!%p1189_p0)  }
 0x1ea   : > { %v1510_v10 = vpop.eup %1509  ;;  %786 = vst [vmem:[#allocation15 + $0x48] sm:$0xff] %v770_v0  ;;  %v2141_v11 = vadd.f32 %v759_v1, %v735_v55  ;;  %v757_v12 = vmul.f32 %v1508_v4, %v2095_v6  ;;  %v802_v30 = vpack.c.bf16 (!%p1189_p0), %v770_v0, %v2117_v43 }
 0x1eb   : > { %v1512_v14 = vpop.eup %1511  ;;  %783 = vst [vmem:[#allocation15 + $0x30] sm:$0xff] %v2137_v5  ;;  %v2146_v15 = vadd.f32 %v749_v7, %v725_v61  ;;  %v752_v16 = vmul.f32 %v1510_v10, %v2095_v6  ;;  %1311 = vmatprep.mubr.bf16.mxu0 (!%p1189_p0), %v798_v60 }
 0x1ec   : > { %v1514_v18 = vpop.eup %1513  ;;  %791 = vst [vmem:[#allocation15 + $0x70] sm:$0xff] %v2141_v11  ;;  %v2151_v19 = vadd.f32 %v757_v12, %v733_v2  ;;  %v760_v20 = vmul.f32 %v1512_v14, %v2095_v6  ;;  %797 = sbr.rel (%p1189_p0) target bundleno = 762 (0x2fa), region = 88  ;;  %1319 = vmatprep.mubr.bf16.mxu1 (!%p1189_p0), %v802_v30 }
 0x1ed   : > { %v1516_v22 = vpop.eup %1515  ;;  %781 = vst [vmem:[#allocation15 + $0x20] sm:$0xff] %v2146_v15  ;;  %v2156_v23 = vadd.f32 %v752_v16, %v728_v8  ;;  %v750_v24 = vmul.f32 %v1514_v18, %v2095_v6 }
 0x1ee   : > { %789 = vst [vmem:[#allocation15 + $0x60] sm:$0xff] %v2151_v19  ;;  %v2160_v25 = vadd.f32 %v760_v20, %v736_v13  ;;  %v758_v26 = vmul.f32 %v1516_v22, %v2095_v6  ;;  %v1517_v6 = vld [vmem:[%s2170_s17 + $0x40] sm:$0xff] (!%p1189_p0)  }
 0x1ef   : > { %784 = vst [vmem:[#allocation15 + $0x38] sm:$0xff] %v2156_v23  ;;  %v766_v27 = vadd.f32 %v750_v24, %v726_v17  ;;  %1295 = vmatprep.subr.bf16.mxu0 (!%p1189_p0), %v1517_v6  ;;  %1343 = vmatprep.subr.bf16.mxu1 (!%p1189_p0), %v1517_v6  ;;  %v801_v43 = vpack.c.bf16 (!%p1189_p0), %v2156_v23, %v2137_v5 }
 0x1f0   : > { %792 = vst [vmem:[#allocation15 + $0x78] sm:$0xff] %v2160_v25  ;;  %v774_v29 = vadd.f32 %v758_v26, %v734_v21  ;;  %1296 = vmatpush3.bf16.msra.mxu0 (!%p1189_p0), %v1517_v6  ;;  %1351 = vmatpush3.bf16.msra.mxu1 (!%p1189_p0), %v1517_v6  ;;  %v805_v44 = vpack.c.bf16 (!%p1189_p0), %v2160_v25, %v2141_v11 }
 0x1f1   : > { %782 = vst [vmem:[#allocation15 + $0x28] sm:$0xff] %v766_v27  ;;  %1297 = vmatprep.subr.bf16.mxu0 (!%p1189_p0), %v1518_v31  ;;  %1344 = vmatprep.subr.bf16.mxu1 (!%p1189_p0), %v1518_v31  ;;  %v800_v41 = vpack.c.bf16 (!%p1189_p0), %v766_v27, %v2146_v15 }
 0x1f2   : > { %790 = vst [vmem:[#allocation15 + $0x68] sm:$0xff] %v774_v29  ;;  %v804_v42 = vpack.c.bf16 (!%p1189_p0), %v774_v29, %v2151_v19 }
 0x1f4   : > { %1298 = vmatpush3.bf16.msra.mxu0 %v1518_v31  ;;  %1352 = vmatpush3.bf16.msra.mxu1 %v1518_v31 }
 0x1f5   : > { %1299 = vmatprep.subr.bf16.mxu0 %v1519_v32  ;;  %1345 = vmatprep.subr.bf16.mxu1 %v1519_v32 }
 0x1f8   : > { %1300 = vmatpush3.bf16.msra.mxu0 %v1519_v32  ;;  %1353 = vmatpush3.bf16.msra.mxu1 %v1519_v32 }
 0x1f9   : > { %1301 = vmatprep.subr.bf16.mxu0 %v1520_v34  ;;  %1346 = vmatprep.subr.bf16.mxu1 %v1520_v34 }
 0x1fc   : > { %1302 = vmatpush3.bf16.msra.mxu0 %v1520_v34  ;;  %1354 = vmatpush3.bf16.msra.mxu1 %v1520_v34 }
 0x1fd   : > { %1303 = vmatprep.subr.bf16.mxu0 %v1521_v35  ;;  %1347 = vmatprep.subr.bf16.mxu1 %v1521_v35 }
 0x200   : > { %1304 = vmatpush3.bf16.msra.mxu0 %v1521_v35  ;;  %1355 = vmatpush3.bf16.msra.mxu1 %v1521_v35 }
 0x201   : > { %1305 = vmatprep.subr.bf16.mxu0 %v1522_v36  ;;  %1348 = vmatprep.subr.bf16.mxu1 %v1522_v36 }
 0x204   : > { %1306 = vmatpush3.bf16.msra.mxu0 %v1522_v36  ;;  %1356 = vmatpush3.bf16.msra.mxu1 %v1522_v36 }
 0x205   : > { %1307 = vmatprep.subr.bf16.mxu0 %v1523_v37  ;;  %1349 = vmatprep.subr.bf16.mxu1 %v1523_v37 }
 0x208   : > { %1308 = vmatpush3.bf16.msra.mxu0 %v1523_v37  ;;  %1357 = vmatpush3.bf16.msra.mxu1 %v1523_v37 }
 0x209   : > { %1309 = vmatprep.subr.bf16.mxu0 %v1524_v38  ;;  %1350 = vmatprep.subr.bf16.mxu1 %v1524_v38 }
 0x20c   : > { %1310 = vmatpush3.bf16.msra.mxu0 %v1524_v38  ;;  %1358 = vmatpush3.bf16.msra.mxu1 %v1524_v38 }
 0x20f   : > { %1312 = vmatmul.mubr.bf16.vlgmr.msra.gmra.mrb[0].mxu0 %v799_v39  ;;  %1320 = vmatmul.mubr.bf16.vlgmr.msra.gmra.mrb[0].mxu1 %v803_v40 }
 0x210   : > { %1315 = vmatprep.mubr.bf16.mxu0 %v800_v41  ;;  %1323 = vmatprep.mubr.bf16.mxu1 %v804_v42 }
 0x217   : > { %1316 = vmatmul.mubr.bf16.gmra.mrb[4].mxu0 %v801_v43  ;;  %1324 = vmatmul.mubr.bf16.gmra.mrb[4].mxu1 %v805_v44 }
 0x2e2   : > { %v1313_v28 = vpop.f32.mrb[0].mxu0  ;;  %v1321_v33 = vpop.f32.mrb[0].mxu1 }
 0x2e3   : > { %v907_v45 = vpop.f32.mrb[1].mxu0  ;;  %v939_v46 = vpop.f32.mrb[1].mxu1 }
 0x2e4   : > { %v1314_v47 = vpop.f32.mrb[2].mxu0  ;;  %v1322_v48 = vpop.f32.mrb[2].mxu1 }
 0x2e5   : > { %v971_v49 = vpack.c.bf16 %v1314_v47, %v1313_v28  ;;  %v975_v50 = vpack.c.bf16 %v1322_v48, %v1321_v33  ;;  %v910_v51 = vpop.f32.mrb[3].mxu0  ;;  %v942_v52 = vpop.f32.mrb[3].mxu1 }
 0x2e6   : > { %v970_v53 = vpack.c.bf16 %v910_v51, %v907_v45  ;;  %v974_v54 = vpack.c.bf16 %v942_v52, %v939_v46 }
 0x2e7   : > { %1217 = vst [vmem:[#allocation2 + $0x48] sm:$0xff] (!%p1215_p1), %v971_v49  ;;  %1221 = vst [vmem:[#allocation2 + $0x68] sm:$0xff] (!%p1215_p1), %v975_v50 }
 0x2e8   : > { %981 = sbr.rel (%p1215_p1) target bundleno = 753 (0x2f1), region = 92  ;;  %1216 = vst [vmem:[#allocation2 + $0x40] sm:$0xff] (!%p1215_p1), %v970_v53  ;;  %1220 = vst [vmem:[#allocation2 + $0x60] sm:$0xff] (!%p1215_p1), %v974_v54 }
 0x2ea   : > { %v1317_v55 = vpop.f32.mrb[4].mxu0  ;;  %v1325_v56 = vpop.f32.mrb[4].mxu1 }
 0x2eb   : > { %v923_v57 = vpop.f32.mrb[5].mxu0  ;;  %v955_v58 = vpop.f32.mrb[5].mxu1 }
 0x2ec   : > { %v1318_v59 = vpop.f32.mrb[6].mxu0  ;;  %v1326_v61 = vpop.f32.mrb[6].mxu1 }
 0x2ed   : > { %v973_v62 = vpack.c.bf16 %v1318_v59, %v1317_v55  ;;  %v977_v63 = vpack.c.bf16 %v1326_v61, %v1325_v56  ;;  %v926_v0 = vpop.f32.mrb[7].mxu0  ;;  %v958_v1 = vpop.f32.mrb[7].mxu1 }
 0x2ee   : > { %v972_v2 = vpack.c.bf16 %v926_v0, %v923_v57  ;;  %v976_v3 = vpack.c.bf16 %v958_v1, %v955_v58 }
 0x2ef   : > { %1219 = vst [vmem:[#allocation2 + $0x58] sm:$0xff] %v973_v62  ;;  %1223 = vst [vmem:[#allocation2 + $0x78] sm:$0xff] %v977_v63 }
 0x2f0   : > { %1218 = vst [vmem:[#allocation2 + $0x50] sm:$0xff] %v972_v2  ;;  %1222 = vst [vmem:[#allocation2 + $0x70] sm:$0xff] %v976_v3 }
 0x2f1 PF: > { %p1224_p4 = scmp.ne.s32.totalorder %s2268_s12, 1 }
 0x2f2   : > { %1003 = vst [vmem:[#allocation2] sm:$0xff] (!%p1224_p4), %v970_v53  ;;  %1004 = vst [vmem:[#allocation2 + $0x8] sm:$0xff] (!%p1224_p4), %v971_v49 }
 0x2f3   : > { %998 = sbr.rel (%p1224_p4) target bundleno = 762 (0x2fa), region = 96  ;;  %1005 = vst [vmem:[#allocation2 + $0x10] sm:$0xff] (!%p1224_p4), %v972_v2  ;;  %1006 = vst [vmem:[#allocation2 + $0x18] sm:$0xff] (!%p1224_p4), %v973_v62 }
 0x2f4   : > { %1007 = vst [vmem:[#allocation2 + $0x20] sm:$0xff] (!%p1224_p4), %v974_v54  ;;  %1008 = vst [vmem:[#allocation2 + $0x28] sm:$0xff] (!%p1224_p4), %v975_v50 }
 0x2f5   : > { %1009 = vst [vmem:[#allocation2 + $0x30] sm:$0xff] (!%p1224_p4), %v976_v3  ;;  %1010 = vst [vmem:[#allocation2 + $0x38] sm:$0xff] (!%p1224_p4), %v977_v63 }
 0x2fa PF: > { %s2259_s24 = sadd.s32 4294967295, %s1789_s26   ;;  %s1804_s20 = smov [#allocation15]  }
 0x2fb   : > { %p2194_p6 = scmp.eq.s32.totalorder %s2259_s24, 2  ;;  %s1017_s21 = sshll.u32 %s1804_s20, 4  ;;  %s1018_s21 = int_to_ptr.vmem [resolvable:$true] %s1017_s21 }
 0x2fc   : > { %s1721_s13 = scalar_lea.vmem %s1018_s21, 2048  ;;  %p1728_p11 = scmp.lt.s32.totalorder %s1018_s21, %s1018_s21 }
 0x2fd   : > { %p1722_p8 = scmp.ne.s32.totalorder %s1018_s21, %s1721_s13  ;;  %p1729_p2 = scmp.lt.s32.totalorder %s1721_s13, %s1721_s13 }
 0x2ff   : > { %p1723_p9 = pnand %p1722_p8, %p2194_p6  ;;  %p1730_p7 = por %p1729_p2, %p1728_p11 }
 0x301   : > { %p1724_p10 = pneg %p1723_p9 }
 0x303   : > { %p1731_p5 = pnand %p1730_p7, %p1724_p10 }
 0x305   : > { %1734 = shalt.err (!%p1731_p5)
}
 0x306   : > { %s1735_s29 = scalar_lea.hbm %s2236_s7, 2048 }
 0x307   : > { %p1736_p3 = scmp.ne.s32.totalorder %s2236_s7, %s1735_s29  ;;  %p1741_p0 = scmp.lt.u32.totalorder %s1735_s29, %s2236_s7 }
 0x309   : > { %p1737_p12 = pnand %p1736_p3, %p2194_p6 }
 0x30b   : > { %p1738_p13 = pneg %p1737_p12 }
 0x30d   : > { %p1743_p1 = pnand %p1741_p0, %p1738_p13 }
 0x30f   : > { %1746 = shalt.err (!%p1743_p1)
}
 0x310   : > { %s1805_s12 = smov 128   ;;  %s1806_s16 = smov 8  }
 0x311   : > { %1388 = dma.vmem_to_hbm [thread:$0]  (%p2194_p6), %s1018_s21, 2048, %s2236_s7, [#allocation5], %s1805_s12, %s1805_s12, %s1806_s16  }
 0x312   : > { %1776 = dma.done.wait (%p2194_p6), [#allocation5], 2048  }
 0x313   : > { %1778 = vsyncadd (%p2194_p6), [#allocation5], 4294965248 }
 0x314 PF: > { %s22_s26 = sadd.s32 1, %s1789_s26   ;;  %s2261_s24 = smov %s1785_s25 }
 0x315   : > { %p19_p4 = scmp.ge.s32.totalorder %s22_s26, 5   ;;  %s2262_s25 = smov %s2264_s14 }
 0x317   :  { %21 = sbr.rel (!%p19_p4) target bundleno = 8 (0x8), region = 132 }
 0x31e   :  { %1033 = vsyncpa [#allocation4], 1 }
 0x31f   :  { %1035 = vsyncpa [#allocation4 + $0x1], 1 }
 0x320   :  { %1036 = vsyncpa [#allocation7], 1 }
 0x321   :  { %1037 = vsyncpa [#allocation10], 1 }
 0x322   :  { %1038 = vsyncpa [#allocation13], 1 }
 0x323   :  { %1039 = vsyncpa [#allocation5], 1 }
 0x324   :  { %1041 = vsyncpa [#allocation5 + $0x1], 1 }

// kernel: tpu_custom_call.1
= control target key start
LH: loop header
LB: loop body
LE: loop exit
PB: predicated region body
PF: predicated region fallthrough
CT: control target
= control target key end

     0   :  { %s2229_s0 = inlined_call_operand.hbm [shape: f32[128,128], index: 0, kind: input, shape index: {}]   ;;  %s2230_s1 = inlined_call_operand.hbm [shape: bf16[128,128], index: 1, kind: input, shape index: {}]   ;;  %s2231_s2 = inlined_call_operand.hbm [shape: bf16[128,128], index: 2, kind: input, shape index: {}]   ;;  %s2232_s3 = inlined_call_operand.hbm [shape: bf16[3,128,128], index: 3, kind: input, shape index: {}]   ;;  %s2233_s4 = inlined_call_operand.hbm [shape: f32[3,1,128], index: 4, kind: input, shape index: {}]   ;;  %s2234_s5 = inlined_call_operand.hbm [shape: f32[3,1,128], index: 5, kind: input, shape index: {}]   ;;  %s2235_s6 = inlined_call_operand.hbm [shape: f32[3,1,128], index: 6, kind: input, shape index: {}]   ;;  %s2236_s7 = inlined_call_operand.hbm [shape: f32[128,128], index: 7, kind: output, shape index: {}]  }
   0x1   :  { %2247 = sst [smem:[#allocation21_spill]] %s2230_s1 }
   0x2   :  { %12 = vsyncpa [#allocation4], 0 }
   0x3   :  { %13 = vsyncpa [#allocation7], 0 }
   0x4   :  { %14 = vsyncpa [#allocation10], 0 }
   0x5   :  { %15 = vsyncpa [#allocation13], 0 }
   0x6   :  { %16 = vsyncpa [#allocation5], 0  ;;  %s1847_s24 = smov 0   ;;  %s1849_s25 = smov 0  }
   0x7   :  { %s1851_s26 = smov 0  }
   0x8 LB: > { %s1791_s27 = smov [#allocation6]   ;;  %s2240_s29 = sadd.s32 4294967295, %s1789_s26   ;;  %s1789_s26 = sphi %s1851_s26, %s22_s26   ;;  %s1785_s25 = sphi %s1849_s25, %s2262_s25   ;;  %s1781_s24 = sphi %s1847_s24, %s2261_s24  }
   0x9   : > { %s240_s28 = sshll.u32 %s1791_s27, 4  ;;  %p1147_p0 = scmp.ge.s32.totalorder %s1789_s26, 1  ;;  %s1871_s28 = int_to_ptr.vmem [resolvable:$true] %s240_s28 }
   0xa   : > { %p212_p1 = scmp.lt.s32.totalorder %s1789_s26, 4  ;;  %p1867_p2 = scmp.eq.s32.totalorder %s2240_s29, 0 }
   0xb   : > { %s1792_s9 = smov [#allocation9]   ;;  %s1793_s12 = smov [#allocation12]  }
   0xc   : > { %s2248_s30 = scalar_select %p1867_p2, 1, 0 }
   0xd   : > { %p1873_p3 = pnand %p1147_p0, %p212_p1  ;;  %s266_s10 = sshll.u32 %s1792_s9, 4  ;;  %s1879_s10 = int_to_ptr.vmem [resolvable:$true] %s266_s10 }
   0xe   : > { %s1887_s13 = sshll.u32 %s1793_s12, 4  ;;  %s2251_s1 = sld [smem:[#allocation21_spill]]  ;;  %s293_s13 = int_to_ptr.vmem [resolvable:$true] %s1887_s13 }
   0xf   : > { %s2249_s8 = scalar_select %p1873_p3, 1, 0 }
  0x10   : > { %p1391_p4 = pneg %p1873_p3 }
  0x12   : > { %p1883_p5 = pnand %p1867_p2, %p1391_p4 }
  0x14   : > { %s1525_s16 = scalar_lea.hbm %s2251_s1, 1024  ;;  %p1897_p7 = pneg %p1883_p5 }
  0x15   : > { %p1526_p6 = scmp.ne.s32.totalorder %s2251_s1, %s1525_s16  ;;  %p1532_p10 = scmp.lt.u32.totalorder %s1525_s16, %s2251_s1 }
  0x17   : > { %p1528_p8 = pnand %p1897_p7, %p1526_p6 }
  0x19   : > { %p1529_p9 = pneg %p1528_p8 }
  0x1b   : > { %p1534_p11 = pnand %p1532_p10, %p1529_p9 }
  0x1d   : > { %1537 = shalt.err (!%p1534_p11)
}
  0x1e   : > { %s1538_s22 = scalar_lea.vmem %s1871_s28, 1024  ;;  %p1546_p1 = scmp.lt.s32.totalorder %s1871_s28, %s1871_s28 }
  0x1f   : > { %p1539_p12 = scmp.ne.s32.totalorder %s1871_s28, %s1538_s22  ;;  %p1547_p4 = scmp.lt.s32.totalorder %s1538_s22, %s1538_s22 }
  0x21   : > { %p1541_p13 = pnand %p1539_p12, %p1897_p7  ;;  %p1548_p6 = por %p1547_p4, %p1546_p1 }
  0x23   : > { %p1542_p0 = pneg %p1541_p13 }
  0x25   : > { %p1549_p8 = pnand %p1548_p6, %p1542_p0 }
  0x27   : > { %1552 = shalt.err (!%p1549_p8)
}
  0x28   : > { %s2245_s23 = smov 64   ;;  %s2246_s27 = smov 4  }
  0x29   : > { %1397 = dma.hbm_to_vmem [thread:$0]  (!%p1883_p5), %s2251_s1, 1024, %s1871_s28, [#allocation7], %s2245_s23, %s2245_s23, %s2246_s27  }
  0x2a   : > { %s1553_s16 = scalar_lea.hbm %s2232_s3, 3072 }
  0x2b   : > { %p1554_p9 = scmp.ne.s32.totalorder %s2232_s3, %s1553_s16  ;;  %p1560_p12 = scmp.lt.u32.totalorder %s1553_s16, %s2232_s3 }
  0x2d   : > { %p1556_p10 = pnand %p1554_p9, %p1897_p7 }
  0x2f   : > { %p1557_p11 = pneg %p1556_p10 }
  0x31   : > { %p1562_p13 = pnand %p1560_p12, %p1557_p11 }
  0x33   : > { %1565 = shalt.err (!%p1562_p13)
}
  0x34   : > { %s1566_s28 = scalar_lea.vmem %s1879_s10, 3072  ;;  %p1574_p6 = scmp.lt.s32.totalorder %s1879_s10, %s1879_s10 }
  0x35   : > { %p1567_p0 = scmp.ne.s32.totalorder %s1879_s10, %s1566_s28  ;;  %p1575_p8 = scmp.lt.s32.totalorder %s1566_s28, %s1566_s28 }
  0x37   : > { %p1569_p1 = pnand %p1567_p0, %p1897_p7  ;;  %p1576_p9 = por %p1575_p8, %p1574_p6 }
  0x39   : > { %p1570_p4 = pneg %p1569_p1 }
  0x3b   : > { %p1577_p10 = pnand %p1576_p9, %p1570_p4 }
  0x3d   : > { %1580 = shalt.err (!%p1577_p10)
}
  0x3e   : > { %1403 = dma.hbm_to_vmem [thread:$0]  (!%p1883_p5), %s2232_s3, 3072, %s1879_s10, [#allocation10], %s2245_s23, %s2245_s23, %s2246_s27  }
  0x3f   : > { %s1581_s15 = scalar_lea.hbm %s2234_s5, 48 }
  0x40   : > { %p1582_p11 = scmp.ne.s32.totalorder %s2234_s5, %s1581_s15  ;;  %p1588_p0 = scmp.lt.u32.totalorder %s1581_s15, %s2234_s5 }
  0x42   : > { %p1584_p12 = pnand %p1582_p11, %p1897_p7 }
  0x44   : > { %p1585_p13 = pneg %p1584_p12 }
  0x46   : > { %p1590_p1 = pnand %p1588_p0, %p1585_p13 }
  0x48   : > { %1593 = shalt.err (!%p1590_p1)
}
  0x49   : > { %s1594_s21 = scalar_lea.vmem %s293_s13, 48  ;;  %s1601_s10 = scalar_lea.vmem %s293_s13, 64 }
  0x4a   : > { %p1595_p4 = scmp.ne.s32.totalorder %s293_s13, %s1594_s21  ;;  %p1602_p9 = scmp.lt.s32.totalorder %s293_s13, %s293_s13 }
  0x4b   : > { %p1603_p10 = scmp.lt.s32.totalorder %s1601_s10, %s1594_s21 }
  0x4c   : > { %p1597_p6 = pnand %p1595_p4, %p1897_p7 }
  0x4d   : > { %p1604_p2 = por %p1603_p10, %p1602_p9 }
  0x4e   : > { %p1598_p8 = pneg %p1597_p6 }
  0x50   : > { %p1605_p3 = pnand %p1604_p2, %p1598_p8 }
  0x52   : > { %1608 = shalt.err (!%p1605_p3)
}
  0x53   : > { %s2241_s28 = smov 16   ;;  %s2243_s22 = smov 1  }
  0x54   : > { %1409 = dma.hbm_to_vmem [thread:$0]  (!%p1883_p5), %s2234_s5, 48, %s293_s13, [#allocation13], %s2241_s28, %s2241_s28, %s2243_s22  }
  0x55   : > { %s34_s14 = sadd.s32 1, %s1785_s25  ;;  %s1798_s15 = smov [#allocation3]  }
  0x56   : > { %p36_p11 = scmp.ge.s32.totalorder %s34_s14, 3  ;;  %s227_s16 = sshll.u32 %s1798_s15, 4  ;;  %s228_s16 = int_to_ptr.vmem [resolvable:$true] %s227_s16 }
  0x57   : > { %s1609_s20 = scalar_lea.hbm %s2229_s0, 2048 }
  0x58   : > { %s2264_s14 = smov (%p36_p11, %s34_s14), 0  ;;  %p1610_p2 = scmp.ne.s32.totalorder %s2229_s0, %s1609_s20 }
  0x59   : > { %p1616_p13 = scmp.lt.u32.totalorder %s1609_s20, %s2229_s0 }
  0x5a   : > { %p1612_p3 = pnand %p1610_p2, %p1897_p7 }
  0x5c   : > { %p1613_p12 = pneg %p1612_p3 }
  0x5e   : > { %p1618_p0 = pnand %p1616_p13, %p1613_p12 }
  0x60   : > { %1621 = shalt.err (!%p1618_p0)
}
  0x61   : > { %s1622_s12 = scalar_lea.vmem %s228_s16, 2048  ;;  %p1630_p8 = scmp.lt.s32.totalorder %s228_s16, %s228_s16 }
  0x62   : > { %p1623_p1 = scmp.ne.s32.totalorder %s228_s16, %s1622_s12  ;;  %p1631_p9 = scmp.lt.s32.totalorder %s1622_s12, %s1622_s12 }
  0x64   : > { %p1625_p4 = pnand %p1623_p1, %p1897_p7  ;;  %p1632_p10 = por %p1631_p9, %p1630_p8 }
  0x66   : > { %p1626_p6 = pneg %p1625_p4 }
  0x68   : > { %p1633_p11 = pnand %p1632_p10, %p1626_p6 }
  0x6a   : > { %1636 = shalt.err (!%p1633_p11)
}
  0x6b   : > { %s1799_s15 = smov 128   ;;  %s1800_s17 = smov 8  }
  0x6c   : > { %1394 = dma.hbm_to_vmem [thread:$0]  (!%p1883_p5), %s2229_s0, 2048, %s228_s16, [#allocation4], %s1799_s15, %s1799_s15, %s1800_s17  }
  0x6d   : > { %s1801_s21 = smov [#allocation8]   ;;  %s1802_s9 = smov [#allocation11]  }
  0x6e   : > { %s253_s10 = sshll.u32 %s1801_s21, 4  ;;  %s279_s13 = sshll.u32 %s1802_s9, 4  ;;  %s254_s10 = int_to_ptr.vmem [resolvable:$true] %s253_s10  ;;  %s280_s13 = int_to_ptr.vmem [resolvable:$true] %s279_s13 }
  0x6f   : > { %s1637_s12 = scalar_lea.hbm %s2231_s2, 1024 }
  0x70   : > { %p1638_p2 = scmp.ne.s32.totalorder %s2231_s2, %s1637_s12  ;;  %p1644_p13 = scmp.lt.u32.totalorder %s1637_s12, %s2231_s2 }
  0x72   : > { %p1640_p3 = pnand %p1638_p2, %p1897_p7 }
  0x74   : > { %p1641_p12 = pneg %p1640_p3 }
  0x76   : > { %p1646_p0 = pnand %p1644_p13, %p1641_p12 }
  0x78   : > { %1649 = shalt.err (!%p1646_p0)
}
  0x79   : > { %s1650_s16 = scalar_lea.vmem %s254_s10, 1024  ;;  %p1658_p8 = scmp.lt.s32.totalorder %s254_s10, %s254_s10 }
  0x7a   : > { %p1651_p1 = scmp.ne.s32.totalorder %s254_s10, %s1650_s16  ;;  %p1659_p9 = scmp.lt.s32.totalorder %s1650_s16, %s1650_s16 }
  0x7c   : > { %p1653_p4 = pnand %p1651_p1, %p1897_p7  ;;  %p1660_p10 = por %p1659_p9, %p1658_p8 }
  0x7e   : > { %p1654_p6 = pneg %p1653_p4 }
  0x80   : > { %p1661_p11 = pnand %p1660_p10, %p1654_p6 }
  0x82   : > { %1664 = shalt.err (!%p1661_p11)
}
  0x83   : > { %s2253_s29 = smov 4   ;;  %s2254_s23 = smov 64  }
  0x84   : > { %1400 = dma.hbm_to_vmem [thread:$0]  (!%p1883_p5), %s2231_s2, 1024, %s254_s10, [#allocation7], %s2254_s23, %s2254_s23, %s2253_s29  }
  0x85   : > { %s1665_s15 = scalar_lea.hbm %s2233_s4, 48 }
  0x86   : > { %p1666_p2 = scmp.ne.s32.totalorder %s2233_s4, %s1665_s15  ;;  %p1672_p13 = scmp.lt.u32.totalorder %s1665_s15, %s2233_s4 }
  0x88   : > { %p1668_p3 = pnand %p1666_p2, %p1897_p7 }
  0x8a   : > { %p1669_p12 = pneg %p1668_p3 }
  0x8c   : > { %p1674_p0 = pnand %p1672_p13, %p1669_p12 }
  0x8e   : > { %1677 = shalt.err (!%p1674_p0)
}
  0x8f   : > { %s1678_s9 = scalar_lea.vmem %s280_s13, 48  ;;  %s1685_s10 = scalar_lea.vmem %s280_s13, 64 }
  0x90   : > { %p1679_p1 = scmp.ne.s32.totalorder %s280_s13, %s1678_s9  ;;  %p1686_p8 = scmp.lt.s32.totalorder %s280_s13, %s280_s13 }
  0x91   : > { %p1687_p9 = scmp.lt.s32.totalorder %s1685_s10, %s1678_s9 }
  0x92   : > { %p1681_p4 = pnand %p1679_p1, %p1897_p7 }
  0x93   : > { %p1688_p10 = por %p1687_p9, %p1686_p8 }
  0x94   : > { %p1682_p6 = pneg %p1681_p4 }
  0x96   : > { %p1689_p11 = pnand %p1688_p10, %p1682_p6 }
  0x98   : > { %1692 = shalt.err (!%p1689_p11)
}
  0x99   : > { %s2255_s12 = smov 1   ;;  %s2256_s16 = smov 16  }
  0x9a   : > { %1406 = dma.hbm_to_vmem [thread:$0]  (!%p1883_p5), %s2233_s4, 48, %s280_s13, [#allocation10], %s2256_s16, %s2256_s16, %s2255_s12  }
  0x9b   : > { %s1803_s1 = smov [#allocation14]   ;;  %s1693_s15 = scalar_lea.hbm %s2235_s6, 48 }
  0x9c   : > { %s305_s27 = sshll.u32 %s1803_s1, 4  ;;  %p1694_p2 = scmp.ne.s32.totalorder %s2235_s6, %s1693_s15  ;;  %s306_s27 = int_to_ptr.vmem [resolvable:$true] %s305_s27 }
  0x9d   : > { %p1700_p13 = scmp.lt.u32.totalorder %s1693_s15, %s2235_s6 }
  0x9e   : > { %p1696_p3 = pnand %p1694_p2, %p1897_p7 }
  0xa0   : > { %p1697_p12 = pneg %p1696_p3 }
  0xa2   : > { %p1702_p0 = pnand %p1700_p13, %p1697_p12 }
  0xa4   : > { %1705 = shalt.err (!%p1702_p0)
}
  0xa5   : > { %s1706_s13 = scalar_lea.vmem %s306_s27, 48  ;;  %s1713_s9 = scalar_lea.vmem %s306_s27, 64 }
  0xa6   : > { %p1707_p1 = scmp.ne.s32.totalorder %s306_s27, %s1706_s13  ;;  %p1714_p8 = scmp.lt.s32.totalorder %s306_s27, %s306_s27 }
  0xa7   : > { %p1715_p9 = scmp.lt.s32.totalorder %s1713_s9, %s1706_s13 }
  0xa8   : > { %p1709_p4 = pnand %p1707_p1, %p1897_p7 }
  0xa9   : > { %p1716_p10 = por %p1715_p9, %p1714_p8 }
  0xaa   : > { %p1710_p6 = pneg %p1709_p4 }
  0xac   : > { %p1717_p11 = pnand %p1716_p10, %p1710_p6 }
  0xae   : > { %1720 = shalt.err (!%p1717_p11)
}
  0xaf   : > { %1412 = dma.hbm_to_vmem [thread:$0]  (!%p1883_p5), %s2235_s6, 48, %s306_s27, [#allocation13], %s2256_s16, %s2256_s16, %s2255_s12  }
  0xb0   : > { %p2257_p2 = scmp.ne.s32.totalorder %s2249_s8, 0 }
  0xb1   : > { %p2258_p7 = scmp.ne.s32.totalorder (!%p2257_p2), %s2248_s30, 0 }
  0xb2   : > { %321 = sbr.rel (%p2257_p2) target bundleno = 788 (0x314), region = 48 }
  0xb9   : > { %1760 = dma.done.wait (%p2258_p7), [#allocation4], 2048  }
  0xba   : > { %1762 = vsyncadd (%p2258_p7), [#allocation4], 4294965248 }
  0xbb   : > { %1764 = dma.done.wait (%p2258_p7), [#allocation7], 2048  }
  0xbc   : > { %1766 = vsyncadd (%p2258_p7), [#allocation7], 4294965248 }
  0xbd   : > { %1768 = dma.done.wait (%p2258_p7), [#allocation10], 3120  }
  0xbe   : > { %1770 = vsyncadd (%p2258_p7), [#allocation10], 4294964176 }
  0xbf   : > { %1772 = dma.done.wait (%p2258_p7), [#allocation13], 96  }
  0xc0   : > { %1774 = vsyncadd (%p2258_p7), [#allocation13], 4294967200  ;;  %p370_p5 = scmp.eq.s32.totalorder %s1781_s24, 0 }
  0xc1   : > { %v1469_v0 = vld [vmem:[#allocation6] sm:$0xff] (%p370_p5)   ;;  %v1470_v1 = vld [vmem:[#allocation6 + $0x8] sm:$0xff] (%p370_p5)   ;;  %v1471_v2 = vld [vmem:[#allocation6 + $0x10] sm:$0xff] (%p370_p5)  }
  0xc2   : > { %375 = sbr.rel (!%p370_p5) target bundleno = 201 (0xc9), region = 80  ;;  %440 = vst [vmem:[#allocation2] sm:$0xff] (%p370_p5), %v1469_v0  ;;  %441 = vst [vmem:[#allocation2 + $0x8] sm:$0xff] (%p370_p5), %v1470_v1  ;;  %v1472_v3 = vld [vmem:[#allocation6 + $0x18] sm:$0xff] (%p370_p5)   ;;  %v1473_v4 = vld [vmem:[#allocation6 + $0x20] sm:$0xff] (%p370_p5)  }
  0xc3   : > { %442 = vst [vmem:[#allocation2 + $0x10] sm:$0xff] (%p370_p5), %v1471_v2  ;;  %443 = vst [vmem:[#allocation2 + $0x18] sm:$0xff] (%p370_p5), %v1472_v3  ;;  %v1474_v5 = vld [vmem:[#allocation6 + $0x28] sm:$0xff] (%p370_p5)   ;;  %v1475_v6 = vld [vmem:[#allocation6 + $0x30] sm:$0xff] (%p370_p5)  }
  0xc4   : > { %444 = vst [vmem:[#allocation2 + $0x20] sm:$0xff] (%p370_p5), %v1473_v4  ;;  %445 = vst [vmem:[#allocation2 + $0x28] sm:$0xff] (%p370_p5), %v1474_v5  ;;  %v1476_v7 = vld [vmem:[#allocation6 + $0x38] sm:$0xff] (%p370_p5)  }
  0xc5   : > { %446 = vst [vmem:[#allocation2 + $0x30] sm:$0xff] (%p370_p5), %v1475_v6  ;;  %447 = vst [vmem:[#allocation2 + $0x38] sm:$0xff] (%p370_p5), %v1476_v7 }
  0xc9 PF: > { %p1172_p3 = scmp.ne.s32.totalorder %s1781_s24, 0 }
  0xca   : > { %v451_v8 = vld [vmem:[#allocation3] sm:$0xff] (!%p1172_p3)  ;;  %v452_v9 = vld [vmem:[#allocation3 + $0x8] sm:$0xff] (!%p1172_p3)  ;;  %v453_v10 = vld [vmem:[#allocation3 + $0x10] sm:$0xff] (!%p1172_p3) }
  0xcb   : > { %450 = sbr.rel (%p1172_p3) target bundleno = 211 (0xd3), region = 84  ;;  %468 = vst [vmem:[#allocation15] sm:$0xff] (!%p1172_p3), %v451_v8  ;;  %469 = vst [vmem:[#allocation15 + $0x8] sm:$0xff] (!%p1172_p3), %v452_v9  ;;  %v454_v11 = vld [vmem:[#allocation3 + $0x18] sm:$0xff] (!%p1172_p3)  ;;  %v455_v12 = vld [vmem:[#allocation3 + $0x20] sm:$0xff] (!%p1172_p3) }
  0xcc   : > { %470 = vst [vmem:[#allocation15 + $0x10] sm:$0xff] (!%p1172_p3), %v453_v10  ;;  %v456_v13 = vld [vmem:[#allocation3 + $0x28] sm:$0xff] (!%p1172_p3)  ;;  %471 = vst [vmem:[#allocation15 + $0x18] sm:$0xff] (!%p1172_p3), %v454_v11  ;;  %v457_v14 = vld [vmem:[#allocation3 + $0x30] sm:$0xff] (!%p1172_p3) }
  0xcd   : > { %472 = vst [vmem:[#allocation15 + $0x20] sm:$0xff] (!%p1172_p3), %v455_v12  ;;  %473 = vst [vmem:[#allocation15 + $0x28] sm:$0xff] (!%p1172_p3), %v456_v13  ;;  %v458_v15 = vld [vmem:[#allocation3 + $0x38] sm:$0xff] (!%p1172_p3)  ;;  %v459_v16 = vld [vmem:[#allocation3 + $0x40] sm:$0xff] (!%p1172_p3) }
  0xce   : > { %474 = vst [vmem:[#allocation15 + $0x30] sm:$0xff] (!%p1172_p3), %v457_v14  ;;  %475 = vst [vmem:[#allocation15 + $0x38] sm:$0xff] (!%p1172_p3), %v458_v15  ;;  %v460_v17 = vld [vmem:[#allocation3 + $0x48] sm:$0xff] (!%p1172_p3)  ;;  %v461_v18 = vld [vmem:[#allocation3 + $0x50] sm:$0xff] (!%p1172_p3) }
  0xcf   : > { %476 = vst [vmem:[#allocation15 + $0x40] sm:$0xff] (!%p1172_p3), %v459_v16  ;;  %v462_v19 = vld [vmem:[#allocation3 + $0x58] sm:$0xff] (!%p1172_p3)  ;;  %477 = vst [vmem:[#allocation15 + $0x48] sm:$0xff] (!%p1172_p3), %v460_v17  ;;  %v463_v20 = vld [vmem:[#allocation3 + $0x60] sm:$0xff] (!%p1172_p3) }
  0xd0   : > { %478 = vst [vmem:[#allocation15 + $0x50] sm:$0xff] (!%p1172_p3), %v461_v18  ;;  %479 = vst [vmem:[#allocation15 + $0x58] sm:$0xff] (!%p1172_p3), %v462_v19  ;;  %v464_v21 = vld [vmem:[#allocation3 + $0x68] sm:$0xff] (!%p1172_p3)  ;;  %v465_v22 = vld [vmem:[#allocation3 + $0x70] sm:$0xff] (!%p1172_p3) }
  0xd1   : > { %480 = vst [vmem:[#allocation15 + $0x60] sm:$0xff] (!%p1172_p3), %v463_v20  ;;  %481 = vst [vmem:[#allocation15 + $0x68] sm:$0xff] (!%p1172_p3), %v464_v21  ;;  %v466_v23 = vld [vmem:[#allocation3 + $0x78] sm:$0xff] (!%p1172_p3) }
  0xd2   : > { %482 = vst [vmem:[#allocation15 + $0x70] sm:$0xff] %v465_v22  ;;  %483 = vst [vmem:[#allocation15 + $0x78] sm:$0xff] %v466_v23 }
  0xd3 PF: > { %p504_p12 = scmp.lt.s32.totalorder %s1781_s24, 0  ;;  %s505_s30 = ssub.s32 0, %s1781_s24  ;;  %v1477_v24 = vld [vmem:[#allocation8] sm:$0xff]   ;;  %v1479_v34 = vld [vmem:[#allocation8 + $0x8] sm:$0xff]   ;;  %v1481_v36 = vld [vmem:[#allocation8 + $0x10] sm:$0xff]  }
  0xd4   : > { %s1173_s8 = smin.u32 %s1781_s24, %s505_s30  ;;  %v1478_v25 = vld [vmem:[#allocation8 + $0x20] sm:$0xff]   ;;  %1279 = vmatprep.mubr.bf16.mxu0 %v1477_v24  ;;  %v1480_v35 = vld [vmem:[#allocation8 + $0x28] sm:$0xff]   ;;  %v1482_v37 = vld [vmem:[#allocation8 + $0x30] sm:$0xff]   ;;  %s793_s1 = sadd.s32 1, %s1781_s24 }
  0xd5   : > { %s507_s11 = sand.u32 1, %s1173_s8   ;;  %1287 = vmatprep.mubr.bf16.mxu1 %v1478_v25  ;;  %v1483_v38 = vld [vmem:[#allocation8 + $0x18] sm:$0xff]   ;;  %s527_s27 = scalar_lea.vmem [#allocation11], %s1781_s24  ;;  %v697_v7 = vld [vmem:[#allocation15] sm:$0xff]  ;;  %v700_v16 = vld [vmem:[#allocation15 + $0x18] sm:$0xff] }
  0xd6   : > { %s508_s19 = ssub.s32 0, %s507_s11  ;;  %v1484_v39 = vld [vmem:[#allocation8 + $0x38] sm:$0xff]   ;;  %v1178_v40 = vld [vmem:[%s527_s27] ss:$0 sm:$0xff]  ;;  %s713_s28 = scalar_lea.vmem [#allocation14], %s1781_s24 }
  0xd7   : > { %s2266_s19 = smov (!%p504_p12, %s508_s19), %s507_s11  ;;  %v699_v59 = vld [vmem:[#allocation15 + $0x10] sm:$0xff]  ;;  %s737_s22 = scalar_lea.vmem [#allocation12], %s1781_s24  ;;  %v705_v12 = vld [vmem:[#allocation15 + $0x40] sm:$0xff] }
  0xd8   : > { %p1175_p13 = scmp.lt.s32.totalorder %s2266_s19, 0  ;;  %s514_s12 = sadd.s32 2, %s2266_s19  ;;  %v2092_v60 = vld [vmem:[%s713_s28] ss:$0 sm:$0xff]  ;;  %v708_v21 = vld [vmem:[#allocation15 + $0x58] sm:$0xff] }
  0xd9   : > { %v707_v1 = vld [vmem:[#allocation15 + $0x50] sm:$0xff]  ;;  %v723_v11 = vmul.f32 %v2092_v60, %v699_v59  ;;  %v721_v20 = vmul.f32 %v2092_v60, %v697_v7  ;;  %v729_v25 = vmul.f32 %v2092_v60, %v705_v12  ;;  %p1189_p0 = scmp.ge.s32.totalorder %s793_s1, 3 }
  0xda   : > { %s2268_s12 = smov (!%p1175_p13, %s514_s12), %s2266_s19  ;;  %v2095_v6 = vld [vmem:[%s737_s22] ss:$0 sm:$0xff]  ;;  %v731_v15 = vmul.f32 %v2092_v60, %v707_v1  ;;  %s1190_s15 = sshll.u32 (!%p1189_p0), %s1781_s24, 6 }
  0xdb   : > { %s1230_s16 = sshll.u32 %s2268_s12, 6  ;;  %s2170_s17 = scalar_lea.vmem (!%p1189_p0), [#allocation9], %s1190_s15 }
  0xdc   : > { %s2079_s23 = scalar_lea.vmem [#allocation2], %s1230_s16  ;;  %p1215_p1 = scmp.ne.s32.totalorder (!%p1189_p0), %s2268_s12, 0 }
  0xdd   : > { %v519_v26 = vld [vmem:[%s2079_s23] sm:$0xff]  ;;  %v520_v27 = vld [vmem:[%s2079_s23 + $0x8] sm:$0xff]  ;;  %v521_v28 = vld [vmem:[%s2079_s23 + $0x10] sm:$0xff] }
  0xde   : > { %1263 = vmatprep.subr.bf16.mxu0 %v519_v26  ;;  %1327 = vmatprep.subr.bf16.mxu1 %v519_v26  ;;  %v522_v29 = vld [vmem:[%s2079_s23 + $0x18] sm:$0xff]  ;;  %v523_v30 = vld [vmem:[%s2079_s23 + $0x20] sm:$0xff]  ;;  %v524_v31 = vld [vmem:[%s2079_s23 + $0x28] sm:$0xff] }
  0xdf   : > { %1264 = vmatpush3.bf16.msra.mxu0 %v519_v26  ;;  %1335 = vmatpush3.bf16.msra.mxu1 %v519_v26  ;;  %v525_v32 = vld [vmem:[%s2079_s23 + $0x30] sm:$0xff]  ;;  %v526_v33 = vld [vmem:[%s2079_s23 + $0x38] sm:$0xff] }
  0xe0   : > { %1265 = vmatprep.subr.bf16.mxu0 %v520_v27  ;;  %1328 = vmatprep.subr.bf16.mxu1 %v520_v27  ;;  %v698_v26 = vld [vmem:[#allocation15 + $0x8] sm:$0xff] }
  0xe3   : > { %1266 = vmatpush3.bf16.msra.mxu0 %v520_v27  ;;  %1336 = vmatpush3.bf16.msra.mxu1 %v520_v27 }
  0xe4   : > { %1267 = vmatprep.subr.bf16.mxu0 %v521_v28  ;;  %1329 = vmatprep.subr.bf16.mxu1 %v521_v28 }
  0xe7   : > { %1268 = vmatpush3.bf16.msra.mxu0 %v521_v28  ;;  %1337 = vmatpush3.bf16.msra.mxu1 %v521_v28 }
  0xe8   : > { %1269 = vmatprep.subr.bf16.mxu0 %v522_v29  ;;  %1330 = vmatprep.subr.bf16.mxu1 %v522_v29 }
  0xeb   : > { %1270 = vmatpush3.bf16.msra.mxu0 %v522_v29  ;;  %1338 = vmatpush3.bf16.msra.mxu1 %v522_v29 }
  0xec   : > { %1271 = vmatprep.subr.bf16.mxu0 %v523_v30  ;;  %1331 = vmatprep.subr.bf16.mxu1 %v523_v30 }
  0xef   : > { %1272 = vmatpush3.bf16.msra.mxu0 %v523_v30  ;;  %1339 = vmatpush3.bf16.msra.mxu1 %v523_v30  ;;  %v724_v30 = vmul.f32 %v2092_v60, %v700_v16 }
  0xf0   : > { %1273 = vmatprep.subr.bf16.mxu0 %v524_v31  ;;  %1332 = vmatprep.subr.bf16.mxu1 %v524_v31 }
  0xf3   : > { %1274 = vmatpush3.bf16.msra.mxu0 %v524_v31  ;;  %1340 = vmatpush3.bf16.msra.mxu1 %v524_v31  ;;  %v706_v31 = vld [vmem:[#allocation15 + $0x48] sm:$0xff] }
  0xf4   : > { %1275 = vmatprep.subr.bf16.mxu0 %v525_v32  ;;  %1333 = vmatprep.subr.bf16.mxu1 %v525_v32 }
  0xf7   : > { %1276 = vmatpush3.bf16.msra.mxu0 %v525_v32  ;;  %1341 = vmatpush3.bf16.msra.mxu1 %v525_v32 }
  0xf8   : > { %1277 = vmatprep.subr.bf16.mxu0 %v526_v33  ;;  %1334 = vmatprep.subr.bf16.mxu1 %v526_v33 }
  0xfb   : > { %1278 = vmatpush3.bf16.msra.mxu0 %v526_v33  ;;  %1342 = vmatpush3.bf16.msra.mxu1 %v526_v33 }
  0xfe   : > { %1280 = vmatmul.mubr.bf16.vlgmr.msra.gmra.mrb[0].mxu0 %v1479_v34  ;;  %1288 = vmatmul.mubr.bf16.vlgmr.msra.gmra.mrb[0].mxu1 %v1480_v35  ;;  %v732_v35 = vmul.f32 %v2092_v60, %v708_v21 }
  0xff   : > { %1283 = vmatprep.mubr.bf16.mxu0 %v1481_v36  ;;  %1291 = vmatprep.mubr.bf16.mxu1 %v1482_v37  ;;  %v703_v36 = vld [vmem:[#allocation15 + $0x30] sm:$0xff] }
 0x106   : > { %1284 = vmatmul.mubr.bf16.gmra.mrb[4].mxu0 %v1483_v38  ;;  %1292 = vmatmul.mubr.bf16.gmra.mrb[4].mxu1 %v1484_v39 }
 0x1d1   : > { %v1281_v41 = vpop.f32.mrb[0].mxu0  ;;  %v1289_v42 = vpop.f32.mrb[0].mxu1 }
 0x1d2   : > { %v626_v43 = vadd.f32 %v1281_v41, %v1178_v40  ;;  %v658_v44 = vadd.f32 %v1289_v42, %v1178_v40  ;;  %v617_v45 = vpop.f32.mrb[1].mxu0  ;;  %v649_v46 = vpop.f32.mrb[1].mxu1  ;;  %v711_v41 = vld [vmem:[#allocation15 + $0x70] sm:$0xff] }
 0x1d3   : > { %v618_v47 = vadd.f32 %v1178_v40, %v617_v45  ;;  %v650_v48 = vadd.f32 %v1178_v40, %v649_v46  ;;  %v1282_v49 = vpop.f32.mrb[2].mxu0  ;;  %v1290_v50 = vpop.f32.mrb[2].mxu1  ;;  %v730_v45 = vmul.f32 %v2092_v60, %v706_v31  ;;  %v701_v46 = vld [vmem:[#allocation15 + $0x20] sm:$0xff] }
 0x1d4   : > { %1485 = vtanh.f32 %v626_v43  ;;  %v629_v51 = vadd.f32 %v1282_v49, %v1178_v40  ;;  %v620_v52 = vpop.f32.mrb[3].mxu0  ;;  %v652_v53 = vpop.f32.mrb[3].mxu1  ;;  %v661_v54 = vadd.f32 %v1290_v50, %v1178_v40  ;;  %v727_v50 = vmul.f32 %v2092_v60, %v703_v36  ;;  %v1518_v31 = vld [vmem:[%s2170_s17 + $0x48] sm:$0xff] (!%p1189_p0)  }
 0x1d5   : > { %1487 = vtanh.f32 %v658_v44  ;;  %v621_v55 = vadd.f32 %v1178_v40, %v620_v52  ;;  %v653_v56 = vadd.f32 %v1178_v40, %v652_v53  ;;  %v1522_v36 = vld [vmem:[%s2170_s17 + $0x68] sm:$0xff] (!%p1189_p0)  }
 0x1d6   : > { %1489 = vtanh.f32 %v618_v47 }
 0x1d7   : > { %1491 = vtanh.f32 %v650_v48 }
 0x1d8   : > { %1493 = vtanh.f32 %v629_v51  ;;  %v709_v51 = vld [vmem:[#allocation15 + $0x60] sm:$0xff] }
 0x1d9   : > { %1495 = vtanh.f32 %v661_v54  ;;  %v1285_v57 = vpop.f32.mrb[4].mxu0  ;;  %v1293_v58 = vpop.f32.mrb[4].mxu1 }
 0x1da   : > { %1497 = vtanh.f32 %v621_v55  ;;  %v642_v61 = vadd.f32 %v1285_v57, %v1178_v40  ;;  %v674_v62 = vadd.f32 %v1293_v58, %v1178_v40  ;;  %v633_v63 = vpop.f32.mrb[5].mxu0  ;;  %v665_v0 = vpop.f32.mrb[5].mxu1  ;;  %v735_v55 = vmul.f32 %v2092_v60, %v711_v41 }
 0x1db   : > { %1499 = vtanh.f32 %v653_v56  ;;  %v634_v2 = vadd.f32 %v1178_v40, %v633_v63  ;;  %v666_v3 = vadd.f32 %v1178_v40, %v665_v0  ;;  %v1286_v4 = vpop.f32.mrb[6].mxu0  ;;  %v1294_v5 = vpop.f32.mrb[6].mxu1  ;;  %v704_v56 = vld [vmem:[#allocation15 + $0x38] sm:$0xff] }
 0x1dc   : > { %1501 = vtanh.f32 %v642_v61  ;;  %v645_v8 = vadd.f32 %v1286_v4, %v1178_v40  ;;  %v636_v9 = vpop.f32.mrb[7].mxu0  ;;  %v668_v10 = vpop.f32.mrb[7].mxu1  ;;  %v677_v13 = vadd.f32 %v1294_v5, %v1178_v40  ;;  %v725_v61 = vmul.f32 %v2092_v60, %v701_v46 }
 0x1dd   : > { %1503 = vtanh.f32 %v674_v62  ;;  %v637_v17 = vadd.f32 %v1178_v40, %v636_v9  ;;  %v669_v22 = vadd.f32 %v1178_v40, %v668_v10  ;;  %v722_v40 = vmul.f32 %v2092_v60, %v698_v26  ;;  %v712_v62 = vld [vmem:[#allocation15 + $0x78] sm:$0xff]  ;;  %v710_v9 = vld [vmem:[#allocation15 + $0x68] sm:$0xff] }
 0x1de   : > { %v1486_v14 = vpop.eup %1485  ;;  %1505 = vtanh.f32 %v634_v2  ;;  %v733_v2 = vmul.f32 %v2092_v60, %v709_v51  ;;  %v734_v21 = vmul.f32 %v2092_v60, %v710_v9 }
 0x1df   : > { %v1488_v18 = vpop.eup %1487  ;;  %v747_v19 = vmul.f32 %v1486_v14, %v2095_v6  ;;  %1507 = vtanh.f32 %v666_v3  ;;  %v702_v3 = vld [vmem:[#allocation15 + $0x28] sm:$0xff] }
 0x1e0   : > { %v1490_v23 = vpop.eup %1489  ;;  %v755_v24 = vmul.f32 %v1488_v18, %v2095_v6  ;;  %1509 = vtanh.f32 %v645_v8  ;;  %v728_v8 = vmul.f32 %v2092_v60, %v704_v56 }
 0x1e1   : > { %v1492_v27 = vpop.eup %1491  ;;  %v2103_v28 = vadd.f32 %v747_v19, %v723_v11  ;;  %v745_v29 = vmul.f32 %v1490_v23, %v2095_v6  ;;  %1511 = vtanh.f32 %v677_v13  ;;  %v736_v13 = vmul.f32 %v2092_v60, %v712_v62 }
 0x1e2   : > { %v1494_v32 = vpop.eup %1493  ;;  %v2107_v33 = vadd.f32 %v755_v24, %v731_v15  ;;  %v753_v34 = vmul.f32 %v1492_v27, %v2095_v6  ;;  %1513 = vtanh.f32 %v637_v17  ;;  %v726_v17 = vmul.f32 %v2092_v60, %v702_v3 }
 0x1e3   : > { %v1496_v37 = vpop.eup %1495  ;;  %779 = vst [vmem:[#allocation15 + $0x10] sm:$0xff] %v2103_v28  ;;  %v2112_v38 = vadd.f32 %v745_v29, %v721_v20  ;;  %v748_v39 = vmul.f32 %v1494_v32, %v2095_v6  ;;  %1515 = vtanh.f32 %v669_v22  ;;  %v1519_v32 = vld [vmem:[%s2170_s17 + $0x50] sm:$0xff] (!%p1189_p0)  }
 0x1e4   : > { %v1498_v42 = vpop.eup %1497  ;;  %787 = vst [vmem:[#allocation15 + $0x50] sm:$0xff] %v2107_v33  ;;  %v2117_v43 = vadd.f32 %v753_v34, %v729_v25  ;;  %v756_v44 = vmul.f32 %v1496_v37, %v2095_v6  ;;  %v1520_v34 = vld [vmem:[%s2170_s17 + $0x58] sm:$0xff] (!%p1189_p0)   ;;  %v1523_v37 = vld [vmem:[%s2170_s17 + $0x70] sm:$0xff] (!%p1189_p0)  }
 0x1e5   : > { %v1500_v47 = vpop.eup %1499  ;;  %777 = vst [vmem:[#allocation15] sm:$0xff] %v2112_v38  ;;  %v2122_v48 = vadd.f32 %v748_v39, %v724_v30  ;;  %v746_v49 = vmul.f32 %v1498_v42, %v2095_v6 }
 0x1e6   : > { %v1502_v52 = vpop.eup %1501  ;;  %785 = vst [vmem:[#allocation15 + $0x40] sm:$0xff] %v2117_v43  ;;  %v2127_v53 = vadd.f32 %v756_v44, %v732_v35  ;;  %v754_v54 = vmul.f32 %v1500_v47, %v2095_v6  ;;  %v1521_v35 = vld [vmem:[%s2170_s17 + $0x60] sm:$0xff] (!%p1189_p0)  }
 0x1e7   : > { %v1504_v57 = vpop.eup %1503  ;;  %780 = vst [vmem:[#allocation15 + $0x18] sm:$0xff] %v2122_v48  ;;  %v762_v58 = vadd.f32 %v746_v49, %v722_v40  ;;  %v751_v59 = vmul.f32 %v1502_v52, %v2095_v6  ;;  %v799_v39 = vpack.c.bf16 (!%p1189_p0), %v2122_v48, %v2103_v28 }
 0x1e8   : > { %v1506_v63 = vpop.eup %1505  ;;  %788 = vst [vmem:[#allocation15 + $0x58] sm:$0xff] %v2127_v53  ;;  %v770_v0 = vadd.f32 %v754_v54, %v730_v45  ;;  %v759_v1 = vmul.f32 %v1504_v57, %v2095_v6  ;;  %v803_v40 = vpack.c.bf16 (!%p1189_p0), %v2127_v53, %v2107_v33 }
 0x1e9   : > { %v1508_v4 = vpop.eup %1507  ;;  %778 = vst [vmem:[#allocation15 + $0x8] sm:$0xff] %v762_v58  ;;  %v2137_v5 = vadd.f32 %v751_v59, %v727_v50  ;;  %v749_v7 = vmul.f32 %v1506_v63, %v2095_v6  ;;  %v798_v60 = vpack.c.bf16 (!%p1189_p0), %v762_v58, %v2112_v38  ;;  %v1524_v38 = vld [vmem:[%s2170_s17 + $0x78] sm:$0xff] (!%p1189_p0)  }
 0x1ea   : > { %v1510_v10 = vpop.eup %1509  ;;  %786 = vst [vmem:[#allocation15 + $0x48] sm:$0xff] %v770_v0  ;;  %v2141_v11 = vadd.f32 %v759_v1, %v735_v55  ;;  %v757_v12 = vmul.f32 %v1508_v4, %v2095_v6  ;;  %v802_v30 = vpack.c.bf16 (!%p1189_p0), %v770_v0, %v2117_v43 }
 0x1eb   : > { %v1512_v14 = vpop.eup %1511  ;;  %783 = vst [vmem:[#allocation15 + $0x30] sm:$0xff] %v2137_v5  ;;  %v2146_v15 = vadd.f32 %v749_v7, %v725_v61  ;;  %v752_v16 = vmul.f32 %v1510_v10, %v2095_v6  ;;  %1311 = vmatprep.mubr.bf16.mxu0 (!%p1189_p0), %v798_v60 }
 0x1ec   : > { %v1514_v18 = vpop.eup %1513  ;;  %791 = vst [vmem:[#allocation15 + $0x70] sm:$0xff] %v2141_v11  ;;  %v2151_v19 = vadd.f32 %v757_v12, %v733_v2  ;;  %v760_v20 = vmul.f32 %v1512_v14, %v2095_v6  ;;  %797 = sbr.rel (%p1189_p0) target bundleno = 762 (0x2fa), region = 88  ;;  %1319 = vmatprep.mubr.bf16.mxu1 (!%p1189_p0), %v802_v30 }
 0x1ed   : > { %v1516_v22 = vpop.eup %1515  ;;  %781 = vst [vmem:[#allocation15 + $0x20] sm:$0xff] %v2146_v15  ;;  %v2156_v23 = vadd.f32 %v752_v16, %v728_v8  ;;  %v750_v24 = vmul.f32 %v1514_v18, %v2095_v6 }
 0x1ee   : > { %789 = vst [vmem:[#allocation15 + $0x60] sm:$0xff] %v2151_v19  ;;  %v2160_v25 = vadd.f32 %v760_v20, %v736_v13  ;;  %v758_v26 = vmul.f32 %v1516_v22, %v2095_v6  ;;  %v1517_v6 = vld [vmem:[%s2170_s17 + $0x40] sm:$0xff] (!%p1189_p0)  }
 0x1ef   : > { %784 = vst [vmem:[#allocation15 + $0x38] sm:$0xff] %v2156_v23  ;;  %v766_v27 = vadd.f32 %v750_v24, %v726_v17  ;;  %1295 = vmatprep.subr.bf16.mxu0 (!%p1189_p0), %v1517_v6  ;;  %1343 = vmatprep.subr.bf16.mxu1 (!%p1189_p0), %v1517_v6  ;;  %v801_v43 = vpack.c.bf16 (!%p1189_p0), %v2156_v23, %v2137_v5 }
 0x1f0   : > { %792 = vst [vmem:[#allocation15 + $0x78] sm:$0xff] %v2160_v25  ;;  %v774_v29 = vadd.f32 %v758_v26, %v734_v21  ;;  %1296 = vmatpush3.bf16.msra.mxu0 (!%p1189_p0), %v1517_v6  ;;  %1351 = vmatpush3.bf16.msra.mxu1 (!%p1189_p0), %v1517_v6  ;;  %v805_v44 = vpack.c.bf16 (!%p1189_p0), %v2160_v25, %v2141_v11 }
 0x1f1   : > { %782 = vst [vmem:[#allocation15 + $0x28] sm:$0xff] %v766_v27  ;;  %1297 = vmatprep.subr.bf16.mxu0 (!%p1189_p0), %v1518_v31  ;;  %1344 = vmatprep.subr.bf16.mxu1 (!%p1189_p0), %v1518_v31  ;;  %v800_v41 = vpack.c.bf16 (!%p1189_p0), %v766_v27, %v2146_v15 }
 0x1f2   : > { %790 = vst [vmem:[#allocation15 + $0x68] sm:$0xff] %v774_v29  ;;  %v804_v42 = vpack.c.bf16 (!%p1189_p0), %v774_v29, %v2151_v19 }
 0x1f4   : > { %1298 = vmatpush3.bf16.msra.mxu0 %v1518_v31  ;;  %1352 = vmatpush3.bf16.msra.mxu1 %v1518_v31 }
 0x1f5   : > { %1299 = vmatprep.subr.bf16.mxu0 %v1519_v32  ;;  %1345 = vmatprep.subr.bf16.mxu1 %v1519_v32 }
 0x1f8   : > { %1300 = vmatpush3.bf16.msra.mxu0 %v1519_v32  ;;  %1353 = vmatpush3.bf16.msra.mxu1 %v1519_v32 }
 0x1f9   : > { %1301 = vmatprep.subr.bf16.mxu0 %v1520_v34  ;;  %1346 = vmatprep.subr.bf16.mxu1 %v1520_v34 }
 0x1fc   : > { %1302 = vmatpush3.bf16.msra.mxu0 %v1520_v34  ;;  %1354 = vmatpush3.bf16.msra.mxu1 %v1520_v34 }
 0x1fd   : > { %1303 = vmatprep.subr.bf16.mxu0 %v1521_v35  ;;  %1347 = vmatprep.subr.bf16.mxu1 %v1521_v35 }
 0x200   : > { %1304 = vmatpush3.bf16.msra.mxu0 %v1521_v35  ;;  %1355 = vmatpush3.bf16.msra.mxu1 %v1521_v35 }
 0x201   : > { %1305 = vmatprep.subr.bf16.mxu0 %v1522_v36  ;;  %1348 = vmatprep.subr.bf16.mxu1 %v1522_v36 }
 0x204   : > { %1306 = vmatpush3.bf16.msra.mxu0 %v1522_v36  ;;  %1356 = vmatpush3.bf16.msra.mxu1 %v1522_v36 }
 0x205   : > { %1307 = vmatprep.subr.bf16.mxu0 %v1523_v37  ;;  %1349 = vmatprep.subr.bf16.mxu1 %v1523_v37 }
 0x208   : > { %1308 = vmatpush3.bf16.msra.mxu0 %v1523_v37  ;;  %1357 = vmatpush3.bf16.msra.mxu1 %v1523_v37 }
 0x209   : > { %1309 = vmatprep.subr.bf16.mxu0 %v1524_v38  ;;  %1350 = vmatprep.subr.bf16.mxu1 %v1524_v38 }
 0x20c   : > { %1310 = vmatpush3.bf16.msra.mxu0 %v1524_v38  ;;  %1358 = vmatpush3.bf16.msra.mxu1 %v1524_v38 }
 0x20f   : > { %1312 = vmatmul.mubr.bf16.vlgmr.msra.gmra.mrb[0].mxu0 %v799_v39  ;;  %1320 = vmatmul.mubr.bf16.vlgmr.msra.gmra.mrb[0].mxu1 %v803_v40 }
 0x210   : > { %1315 = vmatprep.mubr.bf16.mxu0 %v800_v41  ;;  %1323 = vmatprep.mubr.bf16.mxu1 %v804_v42 }
 0x217   : > { %1316 = vmatmul.mubr.bf16.gmra.mrb[4].mxu0 %v801_v43  ;;  %1324 = vmatmul.mubr.bf16.gmra.mrb[4].mxu1 %v805_v44 }
 0x2e2   : > { %v1313_v28 = vpop.f32.mrb[0].mxu0  ;;  %v1321_v33 = vpop.f32.mrb[0].mxu1 }
 0x2e3   : > { %v907_v45 = vpop.f32.mrb[1].mxu0  ;;  %v939_v46 = vpop.f32.mrb[1].mxu1 }
 0x2e4   : > { %v1314_v47 = vpop.f32.mrb[2].mxu0  ;;  %v1322_v48 = vpop.f32.mrb[2].mxu1 }
 0x2e5   : > { %v971_v49 = vpack.c.bf16 %v1314_v47, %v1313_v28  ;;  %v975_v50 = vpack.c.bf16 %v1322_v48, %v1321_v33  ;;  %v910_v51 = vpop.f32.mrb[3].mxu0  ;;  %v942_v52 = vpop.f32.mrb[3].mxu1 }
 0x2e6   : > { %v970_v53 = vpack.c.bf16 %v910_v51, %v907_v45  ;;  %v974_v54 = vpack.c.bf16 %v942_v52, %v939_v46 }
 0x2e7   : > { %1217 = vst [vmem:[#allocation2 + $0x48] sm:$0xff] (!%p1215_p1), %v971_v49  ;;  %1221 = vst [vmem:[#allocation2 + $0x68] sm:$0xff] (!%p1215_p1), %v975_v50 }
 0x2e8   : > { %981 = sbr.rel (%p1215_p1) target bundleno = 753 (0x2f1), region = 92  ;;  %1216 = vst [vmem:[#allocation2 + $0x40] sm:$0xff] (!%p1215_p1), %v970_v53  ;;  %1220 = vst [vmem:[#allocation2 + $0x60] sm:$0xff] (!%p1215_p1), %v974_v54 }
 0x2ea   : > { %v1317_v55 = vpop.f32.mrb[4].mxu0  ;;  %v1325_v56 = vpop.f32.mrb[4].mxu1 }
 0x2eb   : > { %v923_v57 = vpop.f32.mrb[5].mxu0  ;;  %v955_v58 = vpop.f32.mrb[5].mxu1 }
 0x2ec   : > { %v1318_v59 = vpop.f32.mrb[6].mxu0  ;;  %v1326_v61 = vpop.f32.mrb[6].mxu1 }
 0x2ed   : > { %v973_v62 = vpack.c.bf16 %v1318_v59, %v1317_v55  ;;  %v977_v63 = vpack.c.bf16 %v1326_v61, %v1325_v56  ;;  %v926_v0 = vpop.f32.mrb[7].mxu0  ;;  %v958_v1 = vpop.f32.mrb[7].mxu1 }
 0x2ee   : > { %v972_v2 = vpack.c.bf16 %v926_v0, %v923_v57  ;;  %v976_v3 = vpack.c.bf16 %v958_v1, %v955_v58 }
 0x2ef   : > { %1219 = vst [vmem:[#allocation2 + $0x58] sm:$0xff] %v973_v62  ;;  %1223 = vst [vmem:[#allocation2 + $0x78] sm:$0xff] %v977_v63 }
 0x2f0   : > { %1218 = vst [vmem:[#allocation2 + $0x50] sm:$0xff] %v972_v2  ;;  %1222 = vst [vmem:[#allocation2 + $0x70] sm:$0xff] %v976_v3 }
 0x2f1 PF: > { %p1224_p4 = scmp.ne.s32.totalorder %s2268_s12, 1 }
 0x2f2   : > { %1003 = vst [vmem:[#allocation2] sm:$0xff] (!%p1224_p4), %v970_v53  ;;  %1004 = vst [vmem:[#allocation2 + $0x8] sm:$0xff] (!%p1224_p4), %v971_v49 }
 0x2f3   : > { %998 = sbr.rel (%p1224_p4) target bundleno = 762 (0x2fa), region = 96  ;;  %1005 = vst [vmem:[#allocation2 + $0x10] sm:$0xff] (!%p1224_p4), %v972_v2  ;;  %1006 = vst [vmem:[#allocation2 + $0x18] sm:$0xff] (!%p1224_p4), %v973_v62 }
 0x2f4   : > { %1007 = vst [vmem:[#allocation2 + $0x20] sm:$0xff] (!%p1224_p4), %v974_v54  ;;  %1008 = vst [vmem:[#allocation2 + $0x28] sm:$0xff] (!%p1224_p4), %v975_v50 }
 0x2f5   : > { %1009 = vst [vmem:[#allocation2 + $0x30] sm:$0xff] (!%p1224_p4), %v976_v3  ;;  %1010 = vst [vmem:[#allocation2 + $0x38] sm:$0xff] (!%p1224_p4), %v977_v63 }
 0x2fa PF: > { %s2259_s24 = sadd.s32 4294967295, %s1789_s26   ;;  %s1804_s20 = smov [#allocation15]  }
 0x2fb   : > { %p2194_p6 = scmp.eq.s32.totalorder %s2259_s24, 2  ;;  %s1017_s21 = sshll.u32 %s1804_s20, 4  ;;  %s1018_s21 = int_to_ptr.vmem [resolvable:$true] %s1017_s21 }
 0x2fc   : > { %s1721_s13 = scalar_lea.vmem %s1018_s21, 2048  ;;  %p1728_p11 = scmp.lt.s32.totalorder %s1018_s21, %s1018_s21 }
 0x2fd   : > { %p1722_p8 = scmp.ne.s32.totalorder %s1018_s21, %s1721_s13  ;;  %p1729_p2 = scmp.lt.s32.totalorder %s1721_s13, %s1721_s13 }
 0x2ff   : > { %p1723_p9 = pnand %p1722_p8, %p2194_p6  ;;  %p1730_p7 = por %p1729_p2, %p1728_p11 }
 0x301   : > { %p1724_p10 = pneg %p1723_p9 }
 0x303   : > { %p1731_p5 = pnand %p1730_p7, %p1724_p10 }
 0x305   : > { %1734 = shalt.err (!%p1731_p5)
}
 0x306   : > { %s1735_s29 = scalar_lea.hbm %s2236_s7, 2048 }
 0x307   : > { %p1736_p3 = scmp.ne.s32.totalorder %s2236_s7, %s1735_s29  ;;  %p1741_p0 = scmp.lt.u32.totalorder %s1735_s29, %s2236_s7 }
 0x309   : > { %p1737_p12 = pnand %p1736_p3, %p2194_p6 }
 0x30b   : > { %p1738_p13 = pneg %p1737_p12 }
 0x30d   : > { %p1743_p1 = pnand %p1741_p0, %p1738_p13 }
 0x30f   : > { %1746 = shalt.err (!%p1743_p1)
}
 0x310   : > { %s1805_s12 = smov 128   ;;  %s1806_s16 = smov 8  }
 0x311   : > { %1388 = dma.vmem_to_hbm [thread:$0]  (%p2194_p6), %s1018_s21, 2048, %s2236_s7, [#allocation5], %s1805_s12, %s1805_s12, %s1806_s16  }
 0x312   : > { %1776 = dma.done.wait (%p2194_p6), [#allocation5], 2048  }
 0x313   : > { %1778 = vsyncadd (%p2194_p6), [#allocation5], 4294965248 }
 0x314 PF: > { %s22_s26 = sadd.s32 1, %s1789_s26   ;;  %s2261_s24 = smov %s1785_s25 }
 0x315   : > { %p19_p4 = scmp.ge.s32.totalorder %s22_s26, 5   ;;  %s2262_s25 = smov %s2264_s14 }
 0x317   :  { %21 = sbr.rel (!%p19_p4) target bundleno = 8 (0x8), region = 132 }
 0x31e   :  { %1033 = vsyncpa [#allocation4], 1 }
 0x31f   :  { %1035 = vsyncpa [#allocation4 + $0x1], 1 }
 0x320   :  { %1036 = vsyncpa [#allocation7], 1 }
 0x321   :  { %1037 = vsyncpa [#allocation10], 1 }
 0x322   :  { %1038 = vsyncpa [#allocation13], 1 }
 0x323   :  { %1039 = vsyncpa [#allocation5], 1 }
 0x324   :  { %1041 = vsyncpa [#allocation5 + $0x1], 1 }

</bundles_post_ra>
